<compile_context>
chip_gen: v6e
topology: v6e:2x2x1
jax: 0.10.0
libtpu: 0.0.40
codegen_flags: <defaults>
</compile_context>

<pallas_src>
import functools

import numpy as np
import jax
import jax.numpy as jnp
from jax import lax
from jax.experimental import pallas as pl
from jax.experimental.pallas import tpu as pltpu

EPS = 1e-8                        # Model.py `eps`
FORGET_RATE = 1.0 - 10 * EPS      # 1 - 1e-7
LN_EPS = 1e-5                     # nn.LayerNorm default
_LOG_R = float(np.log(np.float32(FORGET_RATE)))
_INV_SQRT2 = float(1.0 / np.sqrt(2.0))


# ----------------------------- shared helpers --------------------------------
def _phi(x):
    """(elu(x) + 1)^5 via explicit multiplies (no pow -> no extra EUP work)."""
    b = jnp.where(x > 0, x + 1.0, jnp.exp(x))
    b2 = b * b
    return b2 * b2 * b


def _erf(x):
    """Abramowitz-Stegun 7.1.26 erf (|err| < 1.5e-7); abs/exp/mul/where only."""
    ax = jnp.abs(x)
    t = pl.reciprocal(1.0 + 0.3275911 * ax)          # exact; approx=True is TODO
    poly = t * (0.254829592 + t * (-0.284496736 + t * (1.421413741
              + t * (-1.453152027 + t * 1.061405429))))
    y = 1.0 - poly * jnp.exp(-ax * ax)
    return jnp.where(x >= 0, y, -y)


def _gelu_exact(x):
    # matches torch.nn.GELU() (erf-based, non-approximate)
    return 0.5 * x * (1.0 + _erf(x * _INV_SQRT2))


def _layernorm(x, gamma, beta):
    mu = jnp.mean(x, axis=-1, keepdims=True)
    xc = x - mu
    var = jnp.mean(xc * xc, axis=-1, keepdims=True)
    return xc * lax.rsqrt(var + LN_EPS) * gamma + beta


def _choose_chunk(t, max_chunk):
    """Pick time-chunk TQ (multiple of 8) and padded length T_pad.

    Prefers the largest multiple-of-8 divisor of t that is <= max_chunk; if
    none exists, pads t up to a multiple of the chunk (fixes the old
    'fall back to one monolithic block' VMEM/serialisation hazard)."""
    max_chunk = max(8, int(max_chunk))
    limit = min(max_chunk, t)
    c = limit - limit % 8
    while c >= 8:
        if t % c == 0:
            return c, t
        c -= 8
    tq = min(max_chunk - max_chunk % 8, ((t + 7) // 8) * 8)
    tq = max(tq, 8)
    t_pad = ((t + tq - 1) // tq) * tq
    return tq, t_pad


# ------------------ the single fused decoder-block kernel --------------------
def _decoder_block_kernel(x_ref,
                          g1_ref, b1_ref, g2_ref, b2_ref, g3_ref, b3_ref,
                          wq_ref, wk_ref, wv_ref, wp_ref,
                          w1_ref, c1_ref, w2_ref, c2_ref,
                          out_ref,
                          mem_ref, zeta_ref,
                          *, mxu_bf16):
    # grid = (B, n_chunks); carried attention state is per-batch-element, so
    # reset it at the first time chunk of every batch element.
    @pl.when(pl.program_id(1) == 0)
    def _():
        mem_ref[...] = jnp.zeros_like(mem_ref)
        zeta_ref[...] = jnp.zeros_like(zeta_ref)

    def mm(a, b):
        # LN / GELU operands are O(1), so bf16 MXU inputs are safe on v6e/v7x;
        # kept off by default to preserve the strict f32 reference check.
        if mxu_bf16:
            a = a.astype(jnp.bfloat16)
            b = b.astype(jnp.bfloat16)
        return jnp.dot(a, b, preferred_element_type=jnp.float32)

    x = x_ref[...]                                             # (TQ, U)
    h1 = _layernorm(x, g1_ref[...], b1_ref[...])

    # --- fused QKV ------------------------------------------------------------
    q = mm(h1, wq_ref[...])                                    # (TQ, D)
    k = mm(h1, wk_ref[...])
    v = mm(h1, wv_ref[...])

    # --- chunked linear attention with carried [memory | zeta] state ----------
    qp = _phi(q)
    kp = _phi(k)
    tq, d = qp.shape

    # rank-1 decay factorisation r^(i-j) = r^i * r^(-j) (local chunk indices)
    i_col = lax.broadcasted_iota(jnp.int32, (tq, 1), 0).astype(jnp.float32)
    q_s = qp * jnp.exp(i_col * _LOG_R)            # phi(q_i) * r^i
    k_s = kp * jnp.exp(i_col * (-_LOG_R))         # phi(k_j) * r^(-j)

    # intra-chunk causal scores (contract last dims directly; no .T relayout)
    scores = lax.dot_general(q_s, k_s, (((1,), (1,)), ((), ())),
                             preferred_element_type=jnp.float32)   # (TQ, TQ)
    row_i = lax.broadcasted_iota(jnp.int32, (tq, tq), 0)
    col_j = lax.broadcasted_iota(jnp.int32, (tq, tq), 1)
    scores = jnp.where(col_j <= row_i, scores, 0.0)

    q_sr = q_s * np.float32(FORGET_RATE)          # phi(q_i) * r^(i+1)

    intra_score = jnp.dot(scores, v, preferred_element_type=jnp.float32)
    inter_score = jnp.dot(q_sr, mem_ref[...], preferred_element_type=jnp.float32)
    intra_zeta = jnp.sum(scores, axis=-1, keepdims=True)              # XLU row-sum
    inter_zeta = jnp.sum(q_sr * zeta_ref[...], axis=-1, keepdims=True)

    score = intra_score + inter_score                                 # (TQ, D)
    scale = intra_zeta + inter_zeta + np.float32(EPS)                 # (TQ, 1)
    attn = score * pl.reciprocal(scale)           # narrow exact divide, bcast mul

    # carried-state update:
    #   state <- r^TQ * state + sum_j (phi(k_j) * r^(TQ-1-j))^T [v_j | 1]
    r_tq = np.float32(np.exp(tq * _LOG_R))
    k_upd = k_s * np.float32(np.exp((tq - 1) * _LOG_R))
    mem_ref[...] = r_tq * mem_ref[...] + lax.dot_general(
        k_upd, v, (((0,), (0,)), ((), ())), preferred_element_type=jnp.float32)
    zeta_ref[...] = r_tq * zeta_ref[...] + jnp.sum(k_upd, axis=0, keepdims=True)

    # bias-free output projection (Dropout(0.2) = eval-mode identity)
    y = jnp.dot(attn, wp_ref[...], preferred_element_type=jnp.float32)  # (TQ, U)

    # --- residual + LN2 + FFN(GELU) + residual + LN3 + outer residual ----------
    h2 = _layernorm(y + h1, g2_ref[...], b2_ref[...])
    z = mm(h2, w1_ref[...]) + c1_ref[...]
    z = _gelu_exact(z)
    ff = mm(z, w2_ref[...]) + c2_ref[...]          # Dropout(0.3) = identity
    h3 = _layernorm(ff + h2, g3_ref[...], b3_ref[...])
    out_ref[...] = h3 + x


# ------------------------------ wrappers --------------------------------------
def prepare_params(p):
    """One-time weight transposes / bias reshapes (done at load, not per call)."""
    f = lambda a: jnp.asarray(a, jnp.float32)
    u = p["g1"].shape[0]
    hid = p["w1"].shape[0]                          # 4 * units
    return {
        "g1": f(p["g1"]).reshape(1, u), "b1": f(p["b1"]).reshape(1, u),
        "g2": f(p["g2"]).reshape(1, u), "b2": f(p["b2"]).reshape(1, u),
        "g3": f(p["g3"]).reshape(1, u), "b3": f(p["b3"]).reshape(1, u),
        "wq_t": f(p["wq"]).T, "wk_t": f(p["wk"]).T, "wv_t": f(p["wv"]).T,
        "wproj_t": f(p["w_proj"]).T,
        "w1_t": f(p["w1"]).T, "c1": f(p["bf1"]).reshape(1, hid),
        "w2_t": f(p["w2"]).T, "c2": f(p["bf2"]).reshape(1, u),
    }


def decoder_only_block(x, prep, *, max_chunk=256, mxu_bf16=False):
    """Fused DecoderOnlyBlock forward.  max_chunk: 256 on v6e/v7x, 128 on v5e."""
    b, t, u = x.shape
    d = prep["wq_t"].shape[1]
    hid = prep["w1_t"].shape[1]

    tq, t_pad = _choose_chunk(t, max_chunk)
    x32 = jnp.asarray(x, jnp.float32)
    if t_pad != t:
        # zero-pad the tail: padded tokens come after all real tokens, so the
        # causal recurrence of the real outputs is unaffected.
        x32 = jnp.pad(x32, ((0, 0), (0, t_pad - t), (0, 0)))
    n_chunks = t_pad // tq

    row3 = lambda bi, ci: (bi, ci, 0)
    const = lambda bi, ci: (0, 0)

    out = pl.pallas_call(
        functools.partial(_decoder_block_kernel, mxu_bf16=mxu_bf16),
        out_shape=jax.ShapeDtypeStruct((b, t_pad, u), jnp.float32),
        grid_spec=pltpu.PrefetchScalarGridSpec(
            num_scalar_prefetch=0,
            grid=(b, n_chunks),
            in_specs=[
                pl.BlockSpec((None, tq, u), row3),        # x chunk
                pl.BlockSpec((1, u), const),              # g1
                pl.BlockSpec((1, u), const),              # b1
                pl.BlockSpec((1, u), const),              # g2
                pl.BlockSpec((1, u), const),              # b2
                pl.BlockSpec((1, u), const),              # g3
                pl.BlockSpec((1, u), const),              # b3
                pl.BlockSpec((u, d), const),              # Wq^T
                pl.BlockSpec((u, d), const),              # Wk^T
                pl.BlockSpec((u, d), const),              # Wv^T
                pl.BlockSpec((d, u), const),              # Wproj^T
                pl.BlockSpec((u, hid), const),            # W1^T
                pl.BlockSpec((1, hid), const),            # b1 (FFN)
                pl.BlockSpec((hid, u), const),            # W2^T
                pl.BlockSpec((1, u), const),              # b2 (FFN)
            ],
            out_specs=pl.BlockSpec((None, tq, u), row3),
            scratch_shapes=[pltpu.VMEM((d, d), jnp.float32),   # carried memory
                            pltpu.VMEM((1, d), jnp.float32)],  # carried zeta
        ),
        compiler_params=pltpu.CompilerParams(
            dimension_semantics=("parallel", "arbitrary")),
    )(x32,
      prep["g1"], prep["b1"], prep["g2"], prep["b2"], prep["g3"], prep["b3"],
      prep["wq_t"], prep["wk_t"], prep["wv_t"], prep["wproj_t"],
      prep["w1_t"], prep["c1"], prep["w2_t"], prep["c2"])

    return out[:, :t, :] if t_pad != t else out


# ------------------------- plain-JAX reference -------------------------------
def _reference_linear_attention(q, k, v):
    qp, kp = _phi(q), _phi(k)
    bsz, t, d = q.shape

    def step(carry, inp):
        mem, zeta = carry
        q_t, k_t, v_t = inp
        delta_zeta = k_t[:, :, None]
        delta_mem = delta_zeta * v_t[:, None, :]
        mem = FORGET_RATE * mem + delta_mem
        zeta = FORGET_RATE * zeta + delta_zeta
        scale = jnp.einsum("bd,bdz->bz", q_t, zeta) + EPS
        score = jnp.einsum("bd,bde->be", q_t, mem)
        return (mem, zeta), score / scale

    init = (jnp.zeros((bsz, d, d), jnp.float32), jnp.zeros((bsz, d, 1), jnp.float32))
    _, ys = lax.scan(step, init, (qp.transpose(1, 0, 2), kp.transpose(1, 0, 2),
                                  v.transpose(1, 0, 2)))
    return ys.transpose(1, 0, 2)


def reference_block(x, p):
    def ln(y, g, bb):
        mu = y.mean(-1, keepdims=True)
        yc = y - mu
        var = (yc * yc).mean(-1, keepdims=True)
        return yc / jnp.sqrt(var + LN_EPS) * g + bb

    h1 = ln(x, p["g1"], p["b1"])
    q, k, v = h1 @ p["wq"].T, h1 @ p["wk"].T, h1 @ p["wv"].T
    a = _reference_linear_attention(q, k, v)
    y = a @ p["w_proj"].T
    h2 = ln(y + h1, p["g2"], p["b2"])
    z = jax.nn.gelu(h2 @ p["w1"].T + p["bf1"], approximate=False)
    ff = z @ p["w2"].T + p["bf2"]
    h3 = ln(ff + h2, p["g3"], p["b3"])
    return h3 + x


if __name__ == "__main__":
    B, T, UNITS, D_MODEL = 2, 16, 32, 64   # DecoderOnlyBlock(units=32); d_model fixed at 64

    root = jax.random.PRNGKey(0)
    ks = jax.random.split(root, 16)

    def uni(k_, shape, fan_in):
        bound = 1.0 / float(np.sqrt(fan_in))
        return jax.random.uniform(k_, shape, jnp.float32, -bound, bound)

    x = jax.random.normal(ks[0], (B, T, UNITS), jnp.float32)
    params = {
        "g1": 1.0 + 0.1 * jax.random.normal(ks[1], (UNITS,), jnp.float32),
        "b1": 0.1 * jax.random.normal(ks[2], (UNITS,), jnp.float32),
        "g2": 1.0 + 0.1 * jax.random.normal(ks[3], (UNITS,), jnp.float32),
        "b2": 0.1 * jax.random.normal(ks[4], (UNITS,), jnp.float32),
        "g3": 1.0 + 0.1 * jax.random.normal(ks[5], (UNITS,), jnp.float32),
        "b3": 0.1 * jax.random.normal(ks[6], (UNITS,), jnp.float32),
        "wq": uni(ks[7], (D_MODEL, UNITS), UNITS),
        "wk": uni(ks[8], (D_MODEL, UNITS), UNITS),
        "wv": uni(ks[9], (D_MODEL, UNITS), UNITS),
        "w_proj": uni(ks[10], (UNITS, D_MODEL), D_MODEL),
        "w1": uni(ks[11], (4 * UNITS, UNITS), UNITS),
        "bf1": uni(ks[12], (4 * UNITS,), UNITS),
        "w2": uni(ks[13], (UNITS, 4 * UNITS), 4 * UNITS),
        "bf2": uni(ks[14], (UNITS,), 4 * UNITS),
    }

    prep = prepare_params(params)   # one-time transposes / reshapes

    # Check 1: max_chunk=8 -> two time chunks, so the carried [memory | zeta]
    # state path of the fused chunked recurrence is actually exercised.
    out = decoder_only_block(x, prep, max_chunk=8)
    out = jax.block_until_ready(out)
    ref = reference_block(x, params)
    assert out.shape == (B, T, UNITS), out.shape
    err = float(jnp.max(jnp.abs(out - ref)))
    assert jnp.allclose(out, ref, rtol=2e-3, atol=2e-3), err

    # Check 2: ragged T=12 with max_chunk=8 exercises the pad-to-chunk fallback
    # (the old _pick_tile monolithic-block hazard is gone).
    T2 = 12
    x2 = jax.random.normal(ks[15], (B, T2, UNITS), jnp.float32)
    out2 = jax.block_until_ready(decoder_only_block(x2, prep, max_chunk=8))
    ref2 = reference_block(x2, params)
    assert out2.shape == (B, T2, UNITS), out2.shape
    err2 = float(jnp.max(jnp.abs(out2 - ref2)))
    assert jnp.allclose(out2, ref2, rtol=2e-3, atol=2e-3), err2

    print("KERNEL_OK")
</pallas_src>

<mosaic_0001>
module attributes {stable_mosaic.version = 11 : i64} {
  func.func @_decoder_block_kernel(%arg0: i32, %arg1: i32, %arg2: memref<1x8x32xf32, #tpu.memory_space<vmem>>, %arg3: memref<1x32xf32, #tpu.memory_space<vmem>>, %arg4: memref<1x32xf32, #tpu.memory_space<vmem>>, %arg5: memref<1x32xf32, #tpu.memory_space<vmem>>, %arg6: memref<1x32xf32, #tpu.memory_space<vmem>>, %arg7: memref<1x32xf32, #tpu.memory_space<vmem>>, %arg8: memref<1x32xf32, #tpu.memory_space<vmem>>, %arg9: memref<32x64xf32, #tpu.memory_space<vmem>>, %arg10: memref<32x64xf32, #tpu.memory_space<vmem>>, %arg11: memref<32x64xf32, #tpu.memory_space<vmem>>, %arg12: memref<64x32xf32, #tpu.memory_space<vmem>>, %arg13: memref<32x128xf32, #tpu.memory_space<vmem>>, %arg14: memref<1x128xf32, #tpu.memory_space<vmem>>, %arg15: memref<128x32xf32, #tpu.memory_space<vmem>>, %arg16: memref<1x32xf32, #tpu.memory_space<vmem>>, %arg17: memref<1x8x32xf32, #tpu.memory_space<vmem>>, %arg18: memref<64x64xf32, #tpu.memory_space<vmem>>, %arg19: memref<1x64xf32, #tpu.memory_space<vmem>>) attributes {dimension_semantics = [#tpu.dimension_semantics<parallel>, #tpu.dimension_semantics<arbitrary>], iteration_bounds = array<i64: 2, 2>, scalar_prefetch = 0 : i64, scratch_operands = 2 : i64, tpu.core_type = #tpu.core_type<tc>, window_params = [{transform_indices = @transform_0, window_bounds = array<i64: 1, 8, 32>}, {pipeline_mode = #tpu.pipeline_mode<synchronous>, transform_indices = @transform_1, window_bounds = array<i64: 1, 32>}, {pipeline_mode = #tpu.pipeline_mode<synchronous>, transform_indices = @transform_2, window_bounds = array<i64: 1, 32>}, {pipeline_mode = #tpu.pipeline_mode<synchronous>, transform_indices = @transform_3, window_bounds = array<i64: 1, 32>}, {pipeline_mode = #tpu.pipeline_mode<synchronous>, transform_indices = @transform_4, window_bounds = array<i64: 1, 32>}, {pipeline_mode = #tpu.pipeline_mode<synchronous>, transform_indices = @transform_5, window_bounds = array<i64: 1, 32>}, {pipeline_mode = #tpu.pipeline_mode<synchronous>, transform_indices = @transform_6, window_bounds = array<i64: 1, 32>}, {pipeline_mode = #tpu.pipeline_mode<synchronous>, transform_indices = @transform_7, window_bounds = array<i64: 32, 64>}, {pipeline_mode = #tpu.pipeline_mode<synchronous>, transform_indices = @transform_8, window_bounds = array<i64: 32, 64>}, {pipeline_mode = #tpu.pipeline_mode<synchronous>, transform_indices = @transform_9, window_bounds = array<i64: 32, 64>}, {pipeline_mode = #tpu.pipeline_mode<synchronous>, transform_indices = @transform_10, window_bounds = array<i64: 64, 32>}, {pipeline_mode = #tpu.pipeline_mode<synchronous>, transform_indices = @transform_11, window_bounds = array<i64: 32, 128>}, {pipeline_mode = #tpu.pipeline_mode<synchronous>, transform_indices = @transform_12, window_bounds = array<i64: 1, 128>}, {pipeline_mode = #tpu.pipeline_mode<synchronous>, transform_indices = @transform_13, window_bounds = array<i64: 128, 32>}, {pipeline_mode = #tpu.pipeline_mode<synchronous>, transform_indices = @transform_14, window_bounds = array<i64: 1, 32>}, {transform_indices = @transform_15, window_bounds = array<i64: 1, 8, 32>}]} {
    %c0_i32 = arith.constant 0 : i32
    %0 = arith.cmpi eq, %arg1, %c0_i32 : i32
    %1 = arith.extui %0 : i1 to i32
    %c0_i32_0 = arith.constant 0 : i32
    %2 = arith.cmpi ne, %1, %c0_i32_0 : i32
    scf.if %2 {
      %cst_99 = arith.constant 0.000000e+00 : f32
      %204 = vector.broadcast %cst_99 : f32 to vector<64x64xf32>
      %c0_100 = arith.constant 0 : index
      %c0_101 = arith.constant 0 : index
      %205 = vector.load %arg18[%c0_100, %c0_101] : memref<64x64xf32, #tpu.memory_space<vmem>>, vector<64x64xf32>
      tpu.vector_store %arg18[%c0_100, %c0_101], %204 {strides = array<i32>} : memref<64x64xf32, #tpu.memory_space<vmem>>, vector<64x64xf32>,
      %cst_102 = arith.constant 0.000000e+00 : f32
      %206 = vector.broadcast %cst_102 : f32 to vector<1x64xf32>
      %c0_103 = arith.constant 0 : index
      %c0_104 = arith.constant 0 : index
      %207 = vector.load %arg19[%c0_103, %c0_104] : memref<1x64xf32, #tpu.memory_space<vmem>>, vector<1x64xf32>
      tpu.vector_store %arg19[%c0_103, %c0_104], %206 {strides = array<i32>} : memref<1x64xf32, #tpu.memory_space<vmem>>, vector<1x64xf32>,
    } else {
    }
    %c0 = arith.constant 0 : index
    %c0_1 = arith.constant 0 : index
    %c0_2 = arith.constant 0 : index
    %3 = vector.load %arg2[%c0, %c0_1, %c0_2] : memref<1x8x32xf32, #tpu.memory_space<vmem>>, vector<1x8x32xf32>
    %4 = vector.shape_cast %3 : vector<1x8x32xf32> to vector<8x32xf32>
    %c0_3 = arith.constant 0 : index
    %c0_4 = arith.constant 0 : index
    %5 = vector.load %arg3[%c0_3, %c0_4] : memref<1x32xf32, #tpu.memory_space<vmem>>, vector<1x32xf32>
    %c0_5 = arith.constant 0 : index
    %c0_6 = arith.constant 0 : index
    %6 = vector.load %arg4[%c0_5, %c0_6] : memref<1x32xf32, #tpu.memory_space<vmem>>, vector<1x32xf32>
    %cst = arith.constant dense<0.000000e+00> : vector<8xf32>
    %7 = vector.multi_reduction <add>, %4, %cst [1] : vector<8x32xf32> to vector<8xf32>
    %8 = vector.shape_cast %7 : vector<8xf32> to vector<8x1xf32>
    %cst_7 = arith.constant 3.200000e+01 : f32
    %9 = vector.broadcast %cst_7 : f32 to vector<8x1xf32>
    %10 = arith.divf %8, %9 : vector<8x1xf32>
    %11 = vector.broadcast %10 : vector<8x1xf32> to vector<8x32xf32>
    %12 = arith.subf %4, %11 : vector<8x32xf32>
    %13 = arith.mulf %12, %12 : vector<8x32xf32>
    %cst_8 = arith.constant dense<0.000000e+00> : vector<8xf32>
    %14 = vector.multi_reduction <add>, %13, %cst_8 [1] : vector<8x32xf32> to vector<8xf32>
    %15 = vector.shape_cast %14 : vector<8xf32> to vector<8x1xf32>
    %cst_9 = arith.constant 3.200000e+01 : f32
    %16 = vector.broadcast %cst_9 : f32 to vector<8x1xf32>
    %17 = arith.divf %15, %16 : vector<8x1xf32>
    %cst_10 = arith.constant 9.99999974E-6 : f32
    %18 = vector.broadcast %cst_10 : f32 to vector<8x1xf32>
    %19 = arith.addf %17, %18 : vector<8x1xf32>
    %20 = math.rsqrt %19 : vector<8x1xf32>
    %21 = vector.broadcast %20 : vector<8x1xf32> to vector<8x32xf32>
    %22 = arith.mulf %12, %21 : vector<8x32xf32>
    %23 = vector.broadcast %5 : vector<1x32xf32> to vector<8x32xf32>
    %24 = arith.mulf %22, %23 : vector<8x32xf32>
    %25 = vector.broadcast %6 : vector<1x32xf32> to vector<8x32xf32>
    %26 = arith.addf %24, %25 : vector<8x32xf32>
    %c0_11 = arith.constant 0 : index
    %c0_12 = arith.constant 0 : index
    %27 = vector.load %arg9[%c0_11, %c0_12] : memref<32x64xf32, #tpu.memory_space<vmem>>, vector<32x64xf32>
    %cst_13 = arith.constant dense<0.000000e+00> : vector<8x64xf32>
    %28 = tpu.matmul %26, %27, %cst_13 {dimension_numbers = #tpu.dot_dimension_numbers<[1], [0], [0], [1], [0, 0, 1, 1], [], []>} : vector<8x32xf32>, vector<32x64xf32>, vector<8x64xf32> -> vector<8x64xf32>
    %c0_14 = arith.constant 0 : index
    %c0_15 = arith.constant 0 : index
    %29 = vector.load %arg10[%c0_14, %c0_15] : memref<32x64xf32, #tpu.memory_space<vmem>>, vector<32x64xf32>
    %cst_16 = arith.constant dense<0.000000e+00> : vector<8x64xf32>
    %30 = tpu.matmul %26, %29, %cst_16 {dimension_numbers = #tpu.dot_dimension_numbers<[1], [0], [0], [1], [0, 0, 1, 1], [], []>} : vector<8x32xf32>, vector<32x64xf32>, vector<8x64xf32> -> vector<8x64xf32>
    %c0_17 = arith.constant 0 : index
    %c0_18 = arith.constant 0 : index
    %31 = vector.load %arg11[%c0_17, %c0_18] : memref<32x64xf32, #tpu.memory_space<vmem>>, vector<32x64xf32>
    %cst_19 = arith.constant dense<0.000000e+00> : vector<8x64xf32>
    %32 = tpu.matmul %26, %31, %cst_19 {dimension_numbers = #tpu.dot_dimension_numbers<[1], [0], [0], [1], [0, 0, 1, 1], [], []>} : vector<8x32xf32>, vector<32x64xf32>, vector<8x64xf32> -> vector<8x64xf32>
    %cst_20 = arith.constant 0.000000e+00 : f32
    %33 = vector.broadcast %cst_20 : f32 to vector<8x64xf32>
    %34 = arith.cmpf ogt, %28, %33 : vector<8x64xf32>
    %cst_21 = arith.constant 1.000000e+00 : f32
    %35 = vector.broadcast %cst_21 : f32 to vector<8x64xf32>
    %36 = arith.addf %28, %35 : vector<8x64xf32>
    %37 = math.exp %28 : vector<8x64xf32>
    %38 = arith.select %34, %36, %37 : vector<8x64xi1>, vector<8x64xf32>
    %39 = arith.mulf %38, %38 : vector<8x64xf32>
    %40 = arith.mulf %39, %39 : vector<8x64xf32>
    %41 = arith.mulf %40, %38 : vector<8x64xf32>
    %cst_22 = arith.constant 0.000000e+00 : f32
    %42 = vector.broadcast %cst_22 : f32 to vector<8x64xf32>
    %43 = arith.cmpf ogt, %30, %42 : vector<8x64xf32>
    %cst_23 = arith.constant 1.000000e+00 : f32
    %44 = vector.broadcast %cst_23 : f32 to vector<8x64xf32>
    %45 = arith.addf %30, %44 : vector<8x64xf32>
    %46 = math.exp %30 : vector<8x64xf32>
    %47 = arith.select %43, %45, %46 : vector<8x64xi1>, vector<8x64xf32>
    %48 = arith.mulf %47, %47 : vector<8x64xf32>
    %49 = arith.mulf %48, %48 : vector<8x64xf32>
    %50 = arith.mulf %49, %47 : vector<8x64xf32>
    %51 = tpu.iota {dimensions = array<i32: 0>} : vector<8x1xi32>
    %52 = arith.sitofp %51 : vector<8x1xi32> to vector<8x1xf32>
    %cst_24 = arith.constant -1.19209304E-7 : f32
    %53 = vector.broadcast %cst_24 : f32 to vector<8x1xf32>
    %54 = arith.mulf %52, %53 : vector<8x1xf32>
    %55 = math.exp %54 : vector<8x1xf32>
    %56 = vector.broadcast %55 : vector<8x1xf32> to vector<8x64xf32>
    %57 = arith.mulf %41, %56 : vector<8x64xf32>
    %cst_25 = arith.constant 1.19209304E-7 : f32
    %58 = vector.broadcast %cst_25 : f32 to vector<8x1xf32>
    %59 = arith.mulf %52, %58 : vector<8x1xf32>
    %60 = math.exp %59 : vector<8x1xf32>
    %61 = vector.broadcast %60 : vector<8x1xf32> to vector<8x64xf32>
    %62 = arith.mulf %50, %61 : vector<8x64xf32>
    %cst_26 = arith.constant dense<0.000000e+00> : vector<8x8xf32>
    %63 = tpu.matmul %57, %62, %cst_26 {dimension_numbers = #tpu.dot_dimension_numbers<[1], [1], [0], [0], [0, 0, 1, 0], [], []>} : vector<8x64xf32>, vector<8x64xf32>, vector<8x8xf32> -> vector<8x8xf32>
    %64 = tpu.iota {dimensions = array<i32: 0>} : vector<8x8xi32>
    %65 = tpu.iota {dimensions = array<i32: 1>} : vector<8x8xi32>
    %66 = arith.cmpi sle, %65, %64 : vector<8x8xi32>
    %cst_27 = arith.constant 0.000000e+00 : f32
    %67 = vector.broadcast %cst_27 : f32 to vector<8x8xf32>
    %68 = arith.select %66, %63, %67 : vector<8x8xi1>, vector<8x8xf32>
    %cst_28 = arith.constant 0.99999988 : f32
    %69 = vector.broadcast %cst_28 : f32 to vector<8x64xf32>
    %70 = arith.mulf %57, %69 : vector<8x64xf32>
    %cst_29 = arith.constant dense<0.000000e+00> : vector<8x64xf32>
    %71 = tpu.matmul %68, %32, %cst_29 {dimension_numbers = #tpu.dot_dimension_numbers<[1], [0], [0], [1], [0, 0, 1, 1], [], []>} : vector<8x8xf32>, vector<8x64xf32>, vector<8x64xf32> -> vector<8x64xf32>
    %c0_30 = arith.constant 0 : index
    %c0_31 = arith.constant 0 : index
    %72 = vector.load %arg18[%c0_30, %c0_31] : memref<64x64xf32, #tpu.memory_space<vmem>>, vector<64x64xf32>
    %cst_32 = arith.constant dense<0.000000e+00> : vector<8x64xf32>
    %73 = tpu.matmul %70, %72, %cst_32 {dimension_numbers = #tpu.dot_dimension_numbers<[1], [0], [0], [1], [0, 0, 1, 1], [], []>} : vector<8x64xf32>, vector<64x64xf32>, vector<8x64xf32> -> vector<8x64xf32>
    %cst_33 = arith.constant dense<0.000000e+00> : vector<8xf32>
    %74 = vector.multi_reduction <add>, %68, %cst_33 [1] : vector<8x8xf32> to vector<8xf32>
    %75 = vector.shape_cast %74 : vector<8xf32> to vector<8x1xf32>
    %c0_34 = arith.constant 0 : index
    %c0_35 = arith.constant 0 : index
    %76 = vector.load %arg19[%c0_34, %c0_35] : memref<1x64xf32, #tpu.memory_space<vmem>>, vector<1x64xf32>
    %77 = vector.broadcast %76 : vector<1x64xf32> to vector<8x64xf32>
    %78 = arith.mulf %70, %77 : vector<8x64xf32>
    %cst_36 = arith.constant dense<0.000000e+00> : vector<8xf32>
    %79 = vector.multi_reduction <add>, %78, %cst_36 [1] : vector<8x64xf32> to vector<8xf32>
    %80 = vector.shape_cast %79 : vector<8xf32> to vector<8x1xf32>
    %81 = arith.addf %71, %73 : vector<8x64xf32>
    %82 = arith.addf %75, %80 : vector<8x1xf32>
    %cst_37 = arith.constant 9.99999993E-9 : f32
    %83 = vector.broadcast %cst_37 : f32 to vector<8x1xf32>
    %84 = arith.addf %82, %83 : vector<8x1xf32>
    %85 = tpu.reciprocal %84 : vector<8x1xf32> -> vector<8x1xf32>
    %86 = vector.broadcast %85 : vector<8x1xf32> to vector<8x64xf32>
    %87 = arith.mulf %81, %86 : vector<8x64xf32>
    %cst_38 = arith.constant 0.999999165 : f32
    %88 = vector.broadcast %cst_38 : f32 to vector<8x64xf32>
    %89 = arith.mulf %62, %88 : vector<8x64xf32>
    %c0_39 = arith.constant 0 : index
    %c0_40 = arith.constant 0 : index
    %90 = vector.load %arg18[%c0_39, %c0_40] : memref<64x64xf32, #tpu.memory_space<vmem>>, vector<64x64xf32>
    %cst_41 = arith.constant 0.999999046 : f32
    %91 = vector.broadcast %cst_41 : f32 to vector<64x64xf32>
    %92 = arith.mulf %91, %90 : vector<64x64xf32>
    %cst_42 = arith.constant dense<0.000000e+00> : vector<64x64xf32>
    %93 = tpu.matmul %89, %32, %cst_42 {dimension_numbers = #tpu.dot_dimension_numbers<[0], [0], [1], [1], [0, 1, 1, 1], [], []>} : vector<8x64xf32>, vector<8x64xf32>, vector<64x64xf32> -> vector<64x64xf32>
    %94 = arith.addf %92, %93 : vector<64x64xf32>
    %c0_43 = arith.constant 0 : index
    %c0_44 = arith.constant 0 : index
    %95 = vector.load %arg18[%c0_43, %c0_44] : memref<64x64xf32, #tpu.memory_space<vmem>>, vector<64x64xf32>
    tpu.vector_store %arg18[%c0_43, %c0_44], %94 {strides = array<i32>} : memref<64x64xf32, #tpu.memory_space<vmem>>, vector<64x64xf32>,
    %c0_45 = arith.constant 0 : index
    %c0_46 = arith.constant 0 : index
    %96 = vector.load %arg19[%c0_45, %c0_46] : memref<1x64xf32, #tpu.memory_space<vmem>>, vector<1x64xf32>
    %cst_47 = arith.constant 0.999999046 : f32
    %97 = vector.broadcast %cst_47 : f32 to vector<1x64xf32>
    %98 = arith.mulf %97, %96 : vector<1x64xf32>
    %cst_48 = arith.constant dense<0.000000e+00> : vector<64xf32>
    %99 = vector.multi_reduction <add>, %89, %cst_48 [0] : vector<8x64xf32> to vector<64xf32>
    %100 = vector.shape_cast %99 : vector<64xf32> to vector<1x64xf32>
    %101 = arith.addf %98, %100 : vector<1x64xf32>
    %c0_49 = arith.constant 0 : index
    %c0_50 = arith.constant 0 : index
    %102 = vector.load %arg19[%c0_49, %c0_50] : memref<1x64xf32, #tpu.memory_space<vmem>>, vector<1x64xf32>
    tpu.vector_store %arg19[%c0_49, %c0_50], %101 {strides = array<i32>} : memref<1x64xf32, #tpu.memory_space<vmem>>, vector<1x64xf32>,
    %c0_51 = arith.constant 0 : index
    %c0_52 = arith.constant 0 : index
    %103 = vector.load %arg12[%c0_51, %c0_52] : memref<64x32xf32, #tpu.memory_space<vmem>>, vector<64x32xf32>
    %cst_53 = arith.constant dense<0.000000e+00> : vector<8x32xf32>
    %104 = tpu.matmul %87, %103, %cst_53 {dimension_numbers = #tpu.dot_dimension_numbers<[1], [0], [0], [1], [0, 0, 1, 1], [], []>} : vector<8x64xf32>, vector<64x32xf32>, vector<8x32xf32> -> vector<8x32xf32>
    %105 = arith.addf %104, %26 : vector<8x32xf32>
    %c0_54 = arith.constant 0 : index
    %c0_55 = arith.constant 0 : index
    %106 = vector.load %arg5[%c0_54, %c0_55] : memref<1x32xf32, #tpu.memory_space<vmem>>, vector<1x32xf32>
    %c0_56 = arith.constant 0 : index
    %c0_57 = arith.constant 0 : index
    %107 = vector.load %arg6[%c0_56, %c0_57] : memref<1x32xf32, #tpu.memory_space<vmem>>, vector<1x32xf32>
    %cst_58 = arith.constant dense<0.000000e+00> : vector<8xf32>
    %108 = vector.multi_reduction <add>, %105, %cst_58 [1] : vector<8x32xf32> to vector<8xf32>
    %109 = vector.shape_cast %108 : vector<8xf32> to vector<8x1xf32>
    %cst_59 = arith.constant 3.200000e+01 : f32
    %110 = vector.broadcast %cst_59 : f32 to vector<8x1xf32>
    %111 = arith.divf %109, %110 : vector<8x1xf32>
    %112 = vector.broadcast %111 : vector<8x1xf32> to vector<8x32xf32>
    %113 = arith.subf %105, %112 : vector<8x32xf32>
    %114 = arith.mulf %113, %113 : vector<8x32xf32>
    %cst_60 = arith.constant dense<0.000000e+00> : vector<8xf32>
    %115 = vector.multi_reduction <add>, %114, %cst_60 [1] : vector<8x32xf32> to vector<8xf32>
    %116 = vector.shape_cast %115 : vector<8xf32> to vector<8x1xf32>
    %cst_61 = arith.constant 3.200000e+01 : f32
    %117 = vector.broadcast %cst_61 : f32 to vector<8x1xf32>
    %118 = arith.divf %116, %117 : vector<8x1xf32>
    %cst_62 = arith.constant 9.99999974E-6 : f32
    %119 = vector.broadcast %cst_62 : f32 to vector<8x1xf32>
    %120 = arith.addf %118, %119 : vector<8x1xf32>
    %121 = math.rsqrt %120 : vector<8x1xf32>
    %122 = vector.broadcast %121 : vector<8x1xf32> to vector<8x32xf32>
    %123 = arith.mulf %113, %122 : vector<8x32xf32>
    %124 = vector.broadcast %106 : vector<1x32xf32> to vector<8x32xf32>
    %125 = arith.mulf %123, %124 : vector<8x32xf32>
    %126 = vector.broadcast %107 : vector<1x32xf32> to vector<8x32xf32>
    %127 = arith.addf %125, %126 : vector<8x32xf32>
    %c0_63 = arith.constant 0 : index
    %c0_64 = arith.constant 0 : index
    %128 = vector.load %arg13[%c0_63, %c0_64] : memref<32x128xf32, #tpu.memory_space<vmem>>, vector<32x128xf32>
    %cst_65 = arith.constant dense<0.000000e+00> : vector<8x128xf32>
    %129 = tpu.matmul %127, %128, %cst_65 {dimension_numbers = #tpu.dot_dimension_numbers<[1], [0], [0], [1], [0, 0, 1, 1], [], []>} : vector<8x32xf32>, vector<32x128xf32>, vector<8x128xf32> -> vector<8x128xf32>
    %c0_66 = arith.constant 0 : index
    %c0_67 = arith.constant 0 : index
    %130 = vector.load %arg14[%c0_66, %c0_67] : memref<1x128xf32, #tpu.memory_space<vmem>>, vector<1x128xf32>
    %131 = vector.broadcast %130 : vector<1x128xf32> to vector<8x128xf32>
    %132 = arith.addf %129, %131 : vector<8x128xf32>
    %cst_68 = arith.constant 5.000000e-01 : f32
    %133 = vector.broadcast %cst_68 : f32 to vector<8x128xf32>
    %134 = arith.mulf %133, %132 : vector<8x128xf32>
    %cst_69 = arith.constant 0.707106769 : f32
    %135 = vector.broadcast %cst_69 : f32 to vector<8x128xf32>
    %136 = arith.mulf %132, %135 : vector<8x128xf32>
    %137 = math.absf %136 : vector<8x128xf32>
    %cst_70 = arith.constant 0.327591091 : f32
    %138 = vector.broadcast %cst_70 : f32 to vector<8x128xf32>
    %139 = arith.mulf %138, %137 : vector<8x128xf32>
    %cst_71 = arith.constant 1.000000e+00 : f32
    %140 = vector.broadcast %cst_71 : f32 to vector<8x128xf32>
    %141 = arith.addf %140, %139 : vector<8x128xf32>
    %142 = tpu.reciprocal %141 : vector<8x128xf32> -> vector<8x128xf32>
    %cst_72 = arith.constant 1.06140542 : f32
    %143 = vector.broadcast %cst_72 : f32 to vector<8x128xf32>
    %144 = arith.mulf %142, %143 : vector<8x128xf32>
    %cst_73 = arith.constant -1.45315206 : f32
    %145 = vector.broadcast %cst_73 : f32 to vector<8x128xf32>
    %146 = arith.addf %145, %144 : vector<8x128xf32>
    %147 = arith.mulf %142, %146 : vector<8x128xf32>
    %cst_74 = arith.constant 1.42141378 : f32
    %148 = vector.broadcast %cst_74 : f32 to vector<8x128xf32>
    %149 = arith.addf %148, %147 : vector<8x128xf32>
    %150 = arith.mulf %142, %149 : vector<8x128xf32>
    %cst_75 = arith.constant -0.284496725 : f32
    %151 = vector.broadcast %cst_75 : f32 to vector<8x128xf32>
    %152 = arith.addf %151, %150 : vector<8x128xf32>
    %153 = arith.mulf %142, %152 : vector<8x128xf32>
    %cst_76 = arith.constant 0.254829586 : f32
    %154 = vector.broadcast %cst_76 : f32 to vector<8x128xf32>
    %155 = arith.addf %154, %153 : vector<8x128xf32>
    %156 = arith.mulf %142, %155 : vector<8x128xf32>
    %cst_77 = arith.constant 0.000000e+00 : f32
    %157 = vector.broadcast %cst_77 : f32 to vector<8x128xf32>
    %158 = arith.subf %157, %137 : vector<8x128xf32>
    %159 = arith.mulf %158, %137 : vector<8x128xf32>
    %160 = math.exp %159 : vector<8x128xf32>
    %161 = arith.mulf %156, %160 : vector<8x128xf32>
    %cst_78 = arith.constant 1.000000e+00 : f32
    %162 = vector.broadcast %cst_78 : f32 to vector<8x128xf32>
    %163 = arith.subf %162, %161 : vector<8x128xf32>
    %cst_79 = arith.constant 0.000000e+00 : f32
    %164 = vector.broadcast %cst_79 : f32 to vector<8x128xf32>
    %165 = arith.cmpf oge, %136, %164 : vector<8x128xf32>
    %cst_80 = arith.constant 0.000000e+00 : f32
    %166 = vector.broadcast %cst_80 : f32 to vector<8x128xf32>
    %167 = arith.subf %166, %163 : vector<8x128xf32>
    %168 = arith.select %165, %163, %167 : vector<8x128xi1>, vector<8x128xf32>
    %cst_81 = arith.constant 1.000000e+00 : f32
    %169 = vector.broadcast %cst_81 : f32 to vector<8x128xf32>
    %170 = arith.addf %169, %168 : vector<8x128xf32>
    %171 = arith.mulf %134, %170 : vector<8x128xf32>
    %c0_82 = arith.constant 0 : index
    %c0_83 = arith.constant 0 : index
    %172 = vector.load %arg15[%c0_82, %c0_83] : memref<128x32xf32, #tpu.memory_space<vmem>>, vector<128x32xf32>
    %cst_84 = arith.constant dense<0.000000e+00> : vector<8x32xf32>
    %173 = tpu.matmul %171, %172, %cst_84 {dimension_numbers = #tpu.dot_dimension_numbers<[1], [0], [0], [1], [0, 0, 1, 1], [], []>} : vector<8x128xf32>, vector<128x32xf32>, vector<8x32xf32> -> vector<8x32xf32>
    %c0_85 = arith.constant 0 : index
    %c0_86 = arith.constant 0 : index
    %174 = vector.load %arg16[%c0_85, %c0_86] : memref<1x32xf32, #tpu.memory_space<vmem>>, vector<1x32xf32>
    %175 = vector.broadcast %174 : vector<1x32xf32> to vector<8x32xf32>
    %176 = arith.addf %173, %175 : vector<8x32xf32>
    %177 = arith.addf %176, %127 : vector<8x32xf32>
    %c0_87 = arith.constant 0 : index
    %c0_88 = arith.constant 0 : index
    %178 = vector.load %arg7[%c0_87, %c0_88] : memref<1x32xf32, #tpu.memory_space<vmem>>, vector<1x32xf32>
    %c0_89 = arith.constant 0 : index
    %c0_90 = arith.constant 0 : index
    %179 = vector.load %arg8[%c0_89, %c0_90] : memref<1x32xf32, #tpu.memory_space<vmem>>, vector<1x32xf32>
    %cst_91 = arith.constant dense<0.000000e+00> : vector<8xf32>
    %180 = vector.multi_reduction <add>, %177, %cst_91 [1] : vector<8x32xf32> to vector<8xf32>
    %181 = vector.shape_cast %180 : vector<8xf32> to vector<8x1xf32>
    %cst_92 = arith.constant 3.200000e+01 : f32
    %182 = vector.broadcast %cst_92 : f32 to vector<8x1xf32>
    %183 = arith.divf %181, %182 : vector<8x1xf32>
    %184 = vector.broadcast %183 : vector<8x1xf32> to vector<8x32xf32>
    %185 = arith.subf %177, %184 : vector<8x32xf32>
    %186 = arith.mulf %185, %185 : vector<8x32xf32>
    %cst_93 = arith.constant dense<0.000000e+00> : vector<8xf32>
    %187 = vector.multi_reduction <add>, %186, %cst_93 [1] : vector<8x32xf32> to vector<8xf32>
    %188 = vector.shape_cast %187 : vector<8xf32> to vector<8x1xf32>
    %cst_94 = arith.constant 3.200000e+01 : f32
    %189 = vector.broadcast %cst_94 : f32 to vector<8x1xf32>
    %190 = arith.divf %188, %189 : vector<8x1xf32>
    %cst_95 = arith.constant 9.99999974E-6 : f32
    %191 = vector.broadcast %cst_95 : f32 to vector<8x1xf32>
    %192 = arith.addf %190, %191 : vector<8x1xf32>
    %193 = math.rsqrt %192 : vector<8x1xf32>
    %194 = vector.broadcast %193 : vector<8x1xf32> to vector<8x32xf32>
    %195 = arith.mulf %185, %194 : vector<8x32xf32>
    %196 = vector.broadcast %178 : vector<1x32xf32> to vector<8x32xf32>
    %197 = arith.mulf %195, %196 : vector<8x32xf32>
    %198 = vector.broadcast %179 : vector<1x32xf32> to vector<8x32xf32>
    %199 = arith.addf %197, %198 : vector<8x32xf32>
    %200 = arith.addf %199, %4 : vector<8x32xf32>
    %c0_96 = arith.constant 0 : index
    %c0_97 = arith.constant 0 : index
    %c0_98 = arith.constant 0 : index
    %201 = vector.load %arg17[%c0_96, %c0_97, %c0_98] : memref<1x8x32xf32, #tpu.memory_space<vmem>>, vector<1x8x32xf32>
    %202 = vector.shape_cast %201 : vector<1x8x32xf32> to vector<8x32xf32>
    %203 = vector.shape_cast %200 : vector<8x32xf32> to vector<1x8x32xf32>
    tpu.vector_store %arg17[%c0_96, %c0_97, %c0_98], %203 {strides = array<i32>} : memref<1x8x32xf32, #tpu.memory_space<vmem>>, vector<1x8x32xf32>,
    return
  }
  func.func @transform_0(%arg0: i32, %arg1: i32) -> (i32, i32, i32) {
    %c0_i32 = arith.constant 0 : i32
    %c0_i32_0 = arith.constant 0 : i32
    return %arg0, %arg1, %c0_i32 : i32, i32, i32
  }
  func.func @transform_1(%arg0: i32, %arg1: i32) -> (i32, i32) {
    %c0_i32 = arith.constant 0 : i32
    %c0_i32_0 = arith.constant 0 : i32
    %c0_i32_1 = arith.constant 0 : i32
    return %c0_i32, %c0_i32_0 : i32, i32
  }
  func.func @transform_2(%arg0: i32, %arg1: i32) -> (i32, i32) {
    %c0_i32 = arith.constant 0 : i32
    %c0_i32_0 = arith.constant 0 : i32
    %c0_i32_1 = arith.constant 0 : i32
    return %c0_i32, %c0_i32_0 : i32, i32
  }
  func.func @transform_3(%arg0: i32, %arg1: i32) -> (i32, i32) {
    %c0_i32 = arith.constant 0 : i32
    %c0_i32_0 = arith.constant 0 : i32
    %c0_i32_1 = arith.constant 0 : i32
    return %c0_i32, %c0_i32_0 : i32, i32
  }
  func.func @transform_4(%arg0: i32, %arg1: i32) -> (i32, i32) {
    %c0_i32 = arith.constant 0 : i32
    %c0_i32_0 = arith.constant 0 : i32
    %c0_i32_1 = arith.constant 0 : i32
    return %c0_i32, %c0_i32_0 : i32, i32
  }
  func.func @transform_5(%arg0: i32, %arg1: i32) -> (i32, i32) {
    %c0_i32 = arith.constant 0 : i32
    %c0_i32_0 = arith.constant 0 : i32
    %c0_i32_1 = arith.constant 0 : i32
    return %c0_i32, %c0_i32_0 : i32, i32
  }
  func.func @transform_6(%arg0: i32, %arg1: i32) -> (i32, i32) {
    %c0_i32 = arith.constant 0 : i32
    %c0_i32_0 = arith.constant 0 : i32
    %c0_i32_1 = arith.constant 0 : i32
    return %c0_i32, %c0_i32_0 : i32, i32
  }
  func.func @transform_7(%arg0: i32, %arg1: i32) -> (i32, i32) {
    %c0_i32 = arith.constant 0 : i32
    %c0_i32_0 = arith.constant 0 : i32
    %c0_i32_1 = arith.constant 0 : i32
    return %c0_i32, %c0_i32_0 : i32, i32
  }
  func.func @transform_8(%arg0: i32, %arg1: i32) -> (i32, i32) {
    %c0_i32 = arith.constant 0 : i32
    %c0_i32_0 = arith.constant 0 : i32
    %c0_i32_1 = arith.constant 0 : i32
    return %c0_i32, %c0_i32_0 : i32, i32
  }
  func.func @transform_9(%arg0: i32, %arg1: i32) -> (i32, i32) {
    %c0_i32 = arith.constant 0 : i32
    %c0_i32_0 = arith.constant 0 : i32
    %c0_i32_1 = arith.constant 0 : i32
    return %c0_i32, %c0_i32_0 : i32, i32
  }
  func.func @transform_10(%arg0: i32, %arg1: i32) -> (i32, i32) {
    %c0_i32 = arith.constant 0 : i32
    %c0_i32_0 = arith.constant 0 : i32
    %c0_i32_1 = arith.constant 0 : i32
    return %c0_i32, %c0_i32_0 : i32, i32
  }
  func.func @transform_11(%arg0: i32, %arg1: i32) -> (i32, i32) {
    %c0_i32 = arith.constant 0 : i32
    %c0_i32_0 = arith.constant 0 : i32
    %c0_i32_1 = arith.constant 0 : i32
    return %c0_i32, %c0_i32_0 : i32, i32
  }
  func.func @transform_12(%arg0: i32, %arg1: i32) -> (i32, i32) {
    %c0_i32 = arith.constant 0 : i32
    %c0_i32_0 = arith.constant 0 : i32
    %c0_i32_1 = arith.constant 0 : i32
    return %c0_i32, %c0_i32_0 : i32, i32
  }
  func.func @transform_13(%arg0: i32, %arg1: i32) -> (i32, i32) {
    %c0_i32 = arith.constant 0 : i32
    %c0_i32_0 = arith.constant 0 : i32
    %c0_i32_1 = arith.constant 0 : i32
    return %c0_i32, %c0_i32_0 : i32, i32
  }
  func.func @transform_14(%arg0: i32, %arg1: i32) -> (i32, i32) {
    %c0_i32 = arith.constant 0 : i32
    %c0_i32_0 = arith.constant 0 : i32
    %c0_i32_1 = arith.constant 0 : i32
    return %c0_i32, %c0_i32_0 : i32, i32
  }
  func.func @transform_15(%arg0: i32, %arg1: i32) -> (i32, i32, i32) {
    %c0_i32 = arith.constant 0 : i32
    %c0_i32_0 = arith.constant 0 : i32
    return %arg0, %arg1, %c0_i32 : i32, i32, i32
  }
}

</mosaic_0001>

<bundles_post_ra>
// kernel: tpu_custom_call.1
= control target key start
LH: loop header
LB: loop body
LE: loop exit
PB: predicated region body
PF: predicated region fallthrough
CT: control target
= control target key end

     0   :  { %s2666_s0 = inlined_call_operand.vmem [shape: f32[2,16,32], index: 0, kind: input, shape index: {}]   ;;  %s2667_s1 = inlined_call_operand.vmem [shape: f32[1,32], index: 1, kind: input, shape index: {}]   ;;  %s2668_s2 = inlined_call_operand.vmem [shape: f32[1,32], index: 2, kind: input, shape index: {}]   ;;  %s2669_s3 = inlined_call_operand.vmem [shape: f32[1,32], index: 3, kind: input, shape index: {}]   ;;  %s2670_s4 = inlined_call_operand.vmem [shape: f32[1,32], index: 4, kind: input, shape index: {}]   ;;  %s2671_s5 = inlined_call_operand.vmem [shape: f32[1,32], index: 5, kind: input, shape index: {}]   ;;  %s2672_s6 = inlined_call_operand.vmem [shape: f32[1,32], index: 6, kind: input, shape index: {}]   ;;  %s2673_s7 = inlined_call_operand.vmem [shape: f32[32,64], index: 7, kind: input, shape index: {}]   ;;  %s2674_s8 = inlined_call_operand.vmem [shape: f32[32,64], index: 8, kind: input, shape index: {}]   ;;  %s2675_s9 = inlined_call_operand.vmem [shape: f32[32,64], index: 9, kind: input, shape index: {}]   ;;  %s2676_s10 = inlined_call_operand.vmem [shape: f32[64,32], index: 10, kind: input, shape index: {}]   ;;  %s2677_s11 = inlined_call_operand.vmem [shape: f32[32,128], index: 11, kind: input, shape index: {}]   ;;  %s2678_s12 = inlined_call_operand.vmem [shape: f32[1,128], index: 12, kind: input, shape index: {}]   ;;  %s2679_s13 = inlined_call_operand.vmem [shape: f32[128,32], index: 13, kind: input, shape index: {}]   ;;  %s2680_s14 = inlined_call_operand.vmem [shape: f32[1,32], index: 14, kind: input, shape index: {}]   ;;  %s2681_s15 = inlined_call_operand.hbm [shape: f32[2,16,32], index: 15, kind: output, shape index: {}]  }
   0x1   :  { %2690 = sst [smem:[#allocation14_spill]] %s2666_s0 }
   0x2   :  { %2691 = sst [smem:[#allocation15_spill]] %s2667_s1 }
   0x3   :  { %2692 = sst [smem:[#allocation16_spill]] %s2668_s2 }
   0x4   :  { %2693 = sst [smem:[#allocation17_spill]] %s2672_s6 }
   0x5   :  { %2694 = sst [smem:[#allocation18_spill]] %s2681_s15 }
   0x6   :  { %20 = vsyncpa [#allocation5], 0 }
   0x7   :  { %22 = vsyncpa [#allocation5 + $0x1], 0  ;;  %s2230_s18 = smov 0   ;;  %s2232_s19 = smov 0  }
   0x8   :  { %s2234_s20 = smov 0   ;;  %s2236_s21 = smov 0  }
   0x9   :  { %s2238_s22 = smov 0   ;;  %s2240_s23 = smov 0  }
   0xa   :  { %s2242_s24 = smov 0   ;;  %s2244_s25 = smov 0  }
   0xb LB: > { %2695 = sst [smem:[#allocation7_spill]] %s2124_s20  ;;  %s1709_s26 = sadd.s32 4294967295, %s2144_s25   ;;  %s2144_s25 = sphi %s2244_s25, %s28_s25   ;;  %s2140_s24 = sphi %s2242_s24, %s2716_s24   ;;  %s2136_s23 = sphi %s2240_s23, %s2715_s23   ;;  %s2132_s22 = sphi %s2238_s22, %s2714_s22   ;;  %s2128_s21 = sphi %s2236_s21, %s2713_s21   ;;  %s2124_s20 = sphi %s2234_s20, %s2712_s20   ;;  %s2120_s19 = sphi %s2232_s19, %s2718_s19   ;;  %s2116_s18 = sphi %s2230_s18, %s2717_s18  }
   0xc   : > { %2696 = sst [smem:[#allocation8_spill]] %s2136_s23  ;;  %s1710_s27 = sadd.s32 4294967294, %s2144_s25  }
   0xd   : > { %2697 = sst [smem:[#allocation9_spill]] %s2140_s24  ;;  %s37_s28 = sadd.s32 1, %s2136_s23 }
   0xe   : > { %p38_p0 = scmp.ge.s32.totalorder %s37_s28, 2  ;;  %s40_s29 = sadd.s32 1, %s2140_s24 }
   0xf   : > { %p381_p1 = scmp.ne.s32.totalorder %s2124_s20, %s2120_s19  ;;  %p382_p2 = scmp.eq.s32.totalorder %s1709_s26, 3 }
  0x10   : > { %s2720_s28 = smov (%p38_p0, %s37_s28), 0  ;;  %s2722_s29 = smov (!%p38_p0, %s40_s29), %s2140_s24 }
  0x11   : > { %2698 = sst [smem:[#allocation10_spill]] %s2720_s28  ;;  %s367_s30 = ssub.s32 %s2136_s23, %s2720_s28 }
  0x12   : > { %p2281_p3 = por %p382_p2, %p381_p1  ;;  %p42_p4 = scmp.ge.s32.totalorder %s2722_s29, 2 }
  0x13   : > { %p387_p5 = scmp.ne.s32.totalorder %s2120_s19, %s2116_s18  ;;  %p388_p6 = scmp.eq.s32.totalorder %s1710_s27, 3 }
  0x14   : > { %p1713_p7 = scmp.ge.s32.totalorder %s2144_s25, 1  ;;  %s2724_s29 = smov (%p42_p4, %s2722_s29), 0 }
  0x15   : > { %2700 = sst [smem:[#allocation11_spill]] %s2724_s29  ;;  %p2290_p8 = por %p388_p6, %p387_p5 }
  0x16   : > { %p459_p9 = scmp.lt.s32.totalorder %s2144_s25, 5  ;;  %s366_s26 = ssub.s32 %s2140_s24, %s2724_s29 }
  0x17   : > { %s2701_s17 = scalar_select %p2290_p8, 1, 0 }
  0x18   : > { %s371_s15 = sadd.s32 1, %s2124_s20  ;;  %s368_s6 = sor.u32 %s367_s30, %s366_s26 }
  0x19   : > { %2702 = sst [smem:[#allocation12_spill]] %s2701_s17  ;;  %p460_p10 = pnand %p1713_p7, %p459_p9 }
  0x1a   : > { %p369_p11 = scmp.eq.s32.totalorder %s368_s6, 0  ;;  %s2689_s27 = sand.u32 (!%p460_p10), 1, %s2120_s19  }
  0x1b   : > { %463 = sbr.rel (%p460_p10) target bundleno = 2236 (0x8bc), region = 80  ;;  %p510_p12 = scmp.lt.s32.totalorder (!%p460_p10), %s2132_s22, 1 }
  0x1c   : > { %s2299_s28 = scalar_select %p369_p11, %s2124_s20, %s371_s15  }
  0x1d   : > { %s2305_s23 = sshll.u32 (!%p460_p10), %s2689_s27, 3  ;;  %p512_p13 = scmp.lt.s32.totalorder (!%p460_p10), %s2128_s21, 1 }
  0x1e   : > { %2703 = sst [smem:[#allocation13_spill]] %s2299_s28  ;;  %s509_s17 = scalar_lea.vmem (!%p460_p10), [#allocation4], %s2305_s23 }
  0x1f   : > { %s2704_s0 = sld [smem:[#allocation14_spill]] (!%p460_p10)  ;;  %p1717_p0 = scmp.ne.s32.totalorder (!%p460_p10), %s2128_s21, 0 }
  0x20   : > { %s511_s29 = scalar_select %p510_p12, %s2132_s22, 1 }
  0x21   : > { %s513_s30 = scalar_select %p512_p13, %s2128_s21, 1 }
  0x22   : > { %s1715_s26 = sshll.u32 %s511_s29, 1  ;;  %521 = sbr.rel (%p1717_p0) target bundleno = 45 (0x2d), region = 84 }
  0x23   : > { %s515_s6 = sadd.s32 %s1715_s26, %s513_s30 }
  0x24   : > { %s1716_s15 = sshll.u32 %s515_s6, 3 }
  0x25   : > { %s517_s20 = scalar_lea.vmem %s2704_s0, %s1716_s15 }
  0x27   : > { %vm522_vm0 = vcmask 523264   ;;  %vm531_vm1 = vcmask 516096   ;;  %v2146_v0 = vmov 0.0  }
  0x28   : > { %523 = vst.msk [vmem:[#allocation2] sm:$0xff] %vm522_vm0, %v2146_v0  ;;  %524 = vst.msk [vmem:[#allocation2 + $0x8] sm:$0xff] %vm522_vm0, %v2146_v0 }
  0x29   : > { %525 = vst.msk [vmem:[#allocation2 + $0x10] sm:$0xff] %vm522_vm0, %v2146_v0  ;;  %526 = vst.msk [vmem:[#allocation2 + $0x18] sm:$0xff] %vm522_vm0, %v2146_v0 }
  0x2a   : > { %527 = vst.msk [vmem:[#allocation2 + $0x20] sm:$0xff] %vm522_vm0, %v2146_v0  ;;  %528 = vst.msk [vmem:[#allocation2 + $0x28] sm:$0xff] %vm522_vm0, %v2146_v0 }
  0x2b   : > { %529 = vst.msk [vmem:[#allocation2 + $0x30] sm:$0xff] %vm522_vm0, %v2146_v0  ;;  %530 = vst.msk [vmem:[#allocation2 + $0x38] sm:$0xff] %vm522_vm0, %v2146_v0 }
  0x2c   : > { %532 = vst.msk [vmem:[#allocation3] sm:$0x1] %vm531_vm1, %v2146_v0 }
  0x2d PF: > { %v2315_v1 = vld [vmem:[%s517_s20] sm:$0xff]  ;;  %vm536_vm2 = vcmask 261120   ;;  %v568_v8 = vld [vmem:[%s2673_s7 + $0x18] sm:$0xff]  ;;  %v2147_v10 = vmov 0.0   ;;  %v567_v11 = vld [vmem:[%s2673_s7 + $0x10] sm:$0xff]  ;;  %vm2148_vm3 = vmmov 0   ;;  %v806_v38 = vlaneseq }
  0x2e   : > { %v537_v2 = vsel %vm536_vm2, %v2315_v1, 0.0  ;;  %v645_v9 = vld [vmem:[%s2674_s8 + $0x18] sm:$0xff]  ;;  %1817 = vmatprep.subr.mxu0 %v2147_v10  ;;  %1828 = vmatprep.subr.mxu1 %v2147_v10  ;;  %v644_v12 = vld [vmem:[%s2674_s8 + $0x10] sm:$0xff]  ;;  %v566_v13 = vld [vmem:[%s2673_s7 + $0x8] sm:$0xff]  ;;  %s2705_s1 = sld [smem:[#allocation15_spill]]  ;;  %vm817_vm6 = vcmask 523264  }
  0x2f   : > { %538 = vadd.xlane.f32.xlu0 %v537_v2  ;;  %1818 = vmatpush3.msra.mxu0 %v568_v8  ;;  %v643_v14 = vld [vmem:[%s2674_s8 + $0x8] sm:$0xff]  ;;  %v565_v15 = vld [vmem:[%s2673_s7] sm:$0xff]  ;;  %s2706_s2 = sld [smem:[#allocation16_spill]]  ;;  %v719_v26 = vld [vmem:[%s2675_s9 + $0x18] sm:$0xff]  ;;  %v2428_v39 = vshrl.u32 %v806_v38, 7  ;;  %vm1268_vm7 = vcmask 516096  }
  0x30   : > { %1829 = vmatpush3.msra.mxu1 %v645_v9  ;;  %1819 = vmatprep.subr.mxu0 %v2147_v10  ;;  %v642_v16 = vld [vmem:[%s2674_s8] sm:$0xff]  ;;  %v718_v27 = vld [vmem:[%s2675_s9 + $0x10] sm:$0xff]  ;;  %v717_v28 = vld [vmem:[%s2675_s9 + $0x8] sm:$0xff]  ;;  %vm980_vm9 = vcmask 64512   ;;  %s1745_s30 = sshll.u32 %s2132_s22, 1  ;;  %s2707_s29 = sld [smem:[#allocation17_spill]] }
  0x31   : > { %1830 = vmatprep.subr.mxu1 %v2147_v10  ;;  %1820 = vmatpush3.msra.mxu0 %v567_v11  ;;  %v716_v29 = vld [vmem:[%s2675_s9] sm:$0xff]  ;;  %v2403_v32 = vld [vmem:[#allocation2 + $0x28] sm:$0xff]  ;;  %v2411_v34 = vld [vmem:[#allocation2 + $0x18] sm:$0xff]  ;;  %v808_v40 = vcvt.s32.f32 %v2428_v39  ;;  %s1627_s15 = sadd.s32 %s2128_s21, %s1745_s30  ;;  %s1631_s27 = sshll.u32 %s509_s17, 4  ;;  %s1632_s27 = int_to_ptr.vmem [resolvable:$true] %s1631_s27 }
  0x32   : > { %1831 = vmatpush3.msra.mxu1 %v644_v12  ;;  %1821 = vmatprep.subr.mxu0 %v2147_v10  ;;  %v2395_v30 = vld [vmem:[#allocation2 + $0x38] sm:$0xff]  ;;  %v2399_v31 = vld [vmem:[#allocation2 + $0x30] sm:$0xff]  ;;  %v2407_v33 = vld [vmem:[#allocation2 + $0x20] sm:$0xff]  ;;  %s1746_s20 = sshll.u32 %s1627_s15, 7  ;;  %s2709_s21 = sand.u32 1, %s2120_s19  }
  0x33   : > { %1832 = vmatprep.subr.mxu1 %v2147_v10  ;;  %1822 = vmatpush3.msra.mxu0 %v566_v13  ;;  %v2415_v35 = vld [vmem:[#allocation2 + $0x10] sm:$0xff]  ;;  %v2419_v36 = vld [vmem:[#allocation2 + $0x8] sm:$0xff]  ;;  %v2423_v37 = vld [vmem:[#allocation2] sm:$0xff]  ;;  %v809_v42 = vmul.f32 -1.192093e-07, %v808_v40  ;;  %s1616_s30 = scalar_lea.sflag [#allocation5], %s2709_s21 }
  0x34   : > { %1833 = vmatpush3.msra.mxu1 %v643_v14  ;;  %1823 = vmatprep.subr.mxu0 %v2147_v10  ;;  %v1718_v21 = vld [vmem:[%s2705_s1] ss:$0 sm:$0xff]  ;;  %v813_v45 = vmul.f32 1.192093e-07, %v808_v40  ;;  %s2708_s1 = sld [smem:[#allocation18_spill]]  ;;  %s2052_s26 = scalar_lea.vmem %s1632_s27, 128 }
  0x35   : > { %1834 = vmatprep.subr.mxu1 %v2147_v10  ;;  %1824 = vmatpush3.msra.mxu0 %v565_v15  ;;  %v1719_v23 = vld [vmem:[%s2706_s2] ss:$0 sm:$0xff]  ;;  %v810_v49 = vmul.f32 1.442695, %v809_v42  ;;  %v1275_v42 = vld [vmem:[%s2676_s10 + $0x28] sm:$0xff]  ;;  %p2053_p1 = scmp.ne.s32.totalorder %s1632_s27, %s2052_s26  ;;  %s2149_s6 = smov [#allocation4]  }
  0x36   : > { %1825 = vmatprep.mubr.msk.f32.mxu0 %vm2148_vm3, %v2147_v10  ;;  %1835 = vmatpush3.msra.mxu1 %v642_v16  ;;  %v814_v50 = vmul.f32 1.442695, %v813_v45  ;;  %v1258_v15 = vld [vmem:[#allocation3] sm:$0x1]  ;;  %v1273_v45 = vld [vmem:[%s2676_s10 + $0x18] sm:$0xff]  ;;  %s2056_s15 = sshll.u32 %s2149_s6, 4  ;;  %s2057_s15 = int_to_ptr.vmem [resolvable:$false] %s2056_s15 }
  0x37   : > { %1836 = vmatprep.mubr.msk.f32.mxu1 %vm2148_vm3, %v2147_v10  ;;  %1839 = vmatprep.subr.mxu0 %v2147_v10  ;;  %p2054_p2 = pnand %p2053_p1, %p2281_p3  ;;  %s2058_s24 = scalar_lea.vmem %s2057_s15, 256 }
  0x38   : > { %1850 = vmatprep.subr.mxu1 %v2147_v10  ;;  %p2059_p5 = scmp.lt.s32.totalorder %s1632_s27, %s2057_s15  ;;  %p2060_p6 = scmp.lt.s32.totalorder %s2058_s24, %s2052_s26 }
  0x39   : > { %p2055_p4 = pneg %p2054_p2 }
  0x3a   : > { %s1629_s2 = scalar_lea.hbm %s2708_s1, %s1746_s20  ;;  %p2061_p7 = por %p2060_p6, %p2059_p5 }
  0x3c   : > { %p2062_p9 = pnand %p2061_p7, %p2055_p4 }
  0xb8   : > { %v539_v3 = vpop.xlane.xlu0 %538 }
  0xb9   : > { %v541_v4 = vmul.f32 0.03125, %v539_v3 }
  0xbb   : > { %v542_v5 = vsub.f32 %v2315_v1, %v541_v4 }
  0xbd   : > { %v543_v6 = vmul.f32 %v542_v5, %v542_v5 }
  0xbf   : > { %v544_v7 = vsel %vm536_vm2, %v543_v6, 0.0  ;;  %v1726_v6 = vld [vmem:[#allocation3] ss:$0 sm:$0xff] }
  0xc0   : > { %545 = vadd.xlane.f32.xlu0 %v544_v7 }
 0x149   : > { %v546_v17 = vpop.xlane.xlu0 %545 }
 0x14a   : > { %v547_v18 = vmul.f32 0.03125, %v546_v17  ;;  %v1259_v17 = vmul.f32 0.99999905, %v1258_v15 }
 0x14c   : > { %v548_v19 = vadd.f32 1e-05, %v547_v18 }
 0x14e   : > { %2032 = vrsqrt.f32 %v548_v19 }
 0x15b   : > { %v2033_v20 = vpop.eup %2032 }
 0x15c   : > { %v550_v22 = vmul.f32 %v2033_v20, %v542_v5 }
 0x15e   : > { %v557_v24 = vmul.f32 %v1718_v21, %v550_v22  ;;  %v895_v21 = vand.u32 127, %v806_v38 }
 0x160   : > { %v2365_v25 = vadd.f32 %v1719_v23, %v557_v24  ;;  %vm896_vm8 = vcmp.le.s32.totalorder %v895_v21, %v2428_v39  ;;  %v1277_v39 = vld [vmem:[%s2676_s10 + $0x38] sm:$0xff] }
 0x162   : > { %1826 = vmatmul.mubr.msk.f32.vlgmr.msra.gmra.mxu0 %vm536_vm2, %v2365_v25  ;;  %1837 = vmatmul.mubr.msk.f32.vlgmr.msra.gmra.mxu1 %vm536_vm2, %v2365_v25 }
 0x163   : > { %1840 = vmatpush3.msra.mxu0 %v719_v26  ;;  %1847 = vmatprep.mubr.msk.f32.mxu0 %vm2148_vm3, %v2147_v10 }
 0x164   : > { %1841 = vmatprep.subr.mxu0 %v2147_v10  ;;  %1852 = vmatprep.mubr.msk.f32.mxu1 %vm2148_vm3, %v2147_v10 }
 0x165   : > { %1842 = vmatpush3.msra.mxu0 %v718_v27 }
 0x166   : > { %1843 = vmatprep.subr.mxu0 %v2147_v10 }
 0x167   : > { %1844 = vmatpush3.msra.mxu0 %v717_v28 }
 0x168   : > { %1845 = vmatprep.subr.mxu0 %v2147_v10 }
 0x169   : > { %1846 = vmatpush3.msra.mxu0 %v716_v29 }
 0x16a   : > { %1848 = vmatmul.mubr.msk.f32.vlgmr.msra.gmra.mxu0 %vm536_vm2, %v2365_v25  ;;  %1855 = vmatprep.subr.mxu0 %v2147_v10 }
 0x16b   : > { %1871 = vmatprep.mubr.msk.f32.mxu0 %vm2148_vm3, %v2147_v10  ;;  %1856 = vmatpush3.msra.mxu0 %v2395_v30 }
 0x16c   : > { %1857 = vmatprep.subr.mxu0 %v2147_v10 }
 0x16d   : > { %1858 = vmatpush3.msra.mxu0 %v2399_v31 }
 0x16e   : > { %1859 = vmatprep.subr.mxu0 %v2147_v10 }
 0x16f   : > { %1860 = vmatpush3.msra.mxu0 %v2403_v32 }
 0x170   : > { %1861 = vmatprep.subr.mxu0 %v2147_v10 }
 0x171   : > { %1862 = vmatpush3.msra.mxu0 %v2407_v33 }
 0x172   : > { %1863 = vmatprep.subr.mxu0 %v2147_v10 }
 0x173   : > { %1864 = vmatpush3.msra.mxu0 %v2411_v34 }
 0x174   : > { %1865 = vmatprep.subr.mxu0 %v2147_v10 }
 0x175   : > { %1866 = vmatpush3.msra.mxu0 %v2415_v35 }
 0x176   : > { %1867 = vmatprep.subr.mxu0 %v2147_v10 }
 0x177   : > { %1868 = vmatpush3.msra.mxu0 %v2419_v36 }
 0x178   : > { %1869 = vmatprep.subr.mxu0 %v2147_v10 }
 0x179   : > { %1870 = vmatpush3.msra.mxu0 %v2423_v37 }
 0x17a   : > { %1874 = vmatprep.subr.mxu0 %v2147_v10 }
 0x222   : > { %v638_v41 = vpop.f32.mrf.mxu0  ;;  %v712_v43 = vpop.f32.mrf.mxu1 }
 0x223   : > { %v792_v44 = vmul.f32 1.442695, %v638_v41  ;;  %v800_v46 = vmul.f32 1.442695, %v712_v43  ;;  %v791_v53 = vadd.f32 1.0, %v638_v41  ;;  %vm790_vm4 = vcmp.gt.f32.partialorder %v638_v41, 0.0 }
 0x224   : > { %v1827_v47 = vpop.f32.mrf.mxu0  ;;  %v1838_v48 = vpop.f32.mrf.mxu1  ;;  %v799_v55 = vadd.f32 1.0, %v712_v43  ;;  %vm798_vm5 = vcmp.gt.f32.partialorder %v712_v43, 0.0  ;;  %v1276_v41 = vld [vmem:[%s2676_s10 + $0x30] sm:$0xff] }
 0x225   : > { %2034 = vpow2.f32 %v792_v44  ;;  %v1274_v44 = vld [vmem:[%s2676_s10 + $0x20] sm:$0xff] }
 0x226   : > { %2036 = vpow2.f32 %v800_v46 }
 0x227   : > { %2038 = vpow2.f32 %v810_v49 }
 0x228   : > { %2040 = vpow2.f32 %v814_v50 }
 0x22a   : > { %v786_v51 = vpop.f32.mrf.mxu0 }
 0x22c   : > { %v1849_v52 = vpop.f32.mrf.mxu0 }
 0x22d   : > { %v1271_v52 = vld [vmem:[%s2676_s10 + $0x8] sm:$0xff] }
 0x232   : > { %v2035_v54 = vpop.eup %2034 }
 0x233   : > { %v2037_v56 = vpop.eup %2036  ;;  %v794_v57 = vsel %vm790_vm4, %v791_v53, %v2035_v54  ;;  %v1270_v53 = vld [vmem:[%s2676_s10] sm:$0xff] }
 0x234   : > { %v795_v58 = vmul.f32 %v794_v57, %v794_v57  ;;  %v802_v59 = vsel %vm798_vm5, %v799_v55, %v2037_v56  ;;  %v2039_v62 = vpop.eup %2038 }
 0x235   : > { %v803_v60 = vmul.f32 %v802_v59, %v802_v59  ;;  %v2041_v0 = vpop.eup %2040 }
 0x236   : > { %v796_v61 = vmul.f32 %v795_v58, %v795_v58 }
 0x237   : > { %v804_v63 = vmul.f32 %v803_v60, %v803_v60 }
 0x238   : > { %v797_v2 = vmul.f32 %v796_v61, %v794_v57 }
 0x239   : > { %v805_v3 = vmul.f32 %v804_v63, %v802_v59  ;;  %v1074_v63 = vmul.f32 0.99999905, %v2419_v36 }
 0x23a   : > { %v812_v4 = vmul.f32 %v2039_v62, %v797_v2 }
 0x23b   : > { %v816_v5 = vmul.f32 %v2041_v0, %v805_v3  ;;  %v1073_v0 = vmul.f32 0.99999905, %v2423_v37  ;;  %v1078_v37 = vmul.f32 0.99999905, %v2403_v32 }
 0x23c   : > { %v898_v7 = vmul.f32 0.9999999, %v812_v4 }
 0x23d   : > { %1851 = vmatpush3.xpose.msk.msra.mxu1 %vm817_vm6, %v816_v5  ;;  %v1072_v8 = vmul.f32 0.99999917, %v816_v5 }
 0x23e   : > { %1872 = vmatmul.mubr.msk.f32.vlgmr.msra.gmra.mxu0 %vm817_vm6, %v898_v7  ;;  %v991_v9 = vmul.f32 %v1726_v6, %v898_v7  ;;  %1912 = vmatprep.subr.mxu1 %v2147_v10  ;;  %v1076_v6 = vmul.f32 0.99999905, %v2411_v34  ;;  %v1075_v7 = vmul.f32 0.99999905, %v2415_v35  ;;  %v1080_v35 = vmul.f32 0.99999905, %v2395_v30 }
 0x23f   : > { %1081 = vxpose.xlu0.b32.start.end [1/1] (short) (narrow) %v1072_v8, 64  ;;  %v1260_v11 = vsel %vm817_vm6, %v1072_v8, 0.0  ;;  %1875 = vmatpush3.msra.mxu0 %v786_v51 }
 0x240   : > { %v1261_v12 = vrot.slane %v1260_v11, 4  ;;  %1853 = vmatmul.mubr.msk.f32.vlgmr.msra.gmra.mxu1 %vm817_vm6, %v812_v4  ;;  %1879 = vmatprep.subr.mxu0 %v786_v51  ;;  %v992_v29 = vsel %vm817_vm6, %v991_v9, 0.0 }
 0x241   : > { %1876 = vmatprep.mubr.msk.f32.mxu0 %vm2148_vm3, %v2147_v10  ;;  %1920 = vmatprep.mubr.msk.f32.mxu1 %vm2148_vm3, %v2147_v10 }
 0x242   : > { %v1262_v13 = vadd.f32 %v1261_v12, %v1260_v11  ;;  %v1077_v12 = vmul.f32 0.99999905, %v2407_v33 }
 0x244   : > { %v1263_v14 = vrot.slane %v1262_v13, 2 }
 0x246   : > { %v1264_v16 = vadd.f32 %v1263_v14, %v1262_v13 }
 0x248   : > { %v1265_v18 = vrot.slane %v1264_v16, 1 }
 0x24a   : > { %v1266_v19 = vadd.f32 %v1265_v18, %v1264_v16  ;;  %v1079_v16 = vmul.f32 0.99999905, %v2399_v31 }
 0x24c   : > { %v1267_v20 = vadd.f32 %v1266_v19, %v1259_v17 }
 0x24e   : > { %1269 = vst.msk [vmem:[#allocation3] sm:$0x1] %vm1268_vm7, %v1267_v20 }
 0x2bb   : > { %v1097_v38 = vpop.trf.xlu0 }
 0x2bf   : > { %v1098_v40 = vpop.trf.xlu0 }
 0x2c3   : > { %v1099_v43 = vpop.trf.xlu0 }
 0x2c7   : > { %v1100_v46 = vpop.trf.xlu0 }
 0x2cb   : > { %v1101_v47 = vpop.trf.xlu0 }
 0x2cf   : > { %v1102_v48 = vpop.trf.xlu0 }
 0x2d3   : > { %v1103_v49 = vpop.trf.xlu0 }
 0x2d7   : > { %v1104_v50 = vpop.trf.xlu0 }
 0x2fe   : > { %v976_v22 = vpop.f32.mrf.mxu0 }
 0x300   : > { %v890_v23 = vpop.f32.mrf.mxu1  ;;  %v1873_v24 = vpop.f32.mrf.mxu0 }
 0x301   : > { %v897_v26 = vsel %vm896_vm8, %v890_v23, 0.0 }
 0x302   : > { %v1854_v27 = vpop.f32.mrf.mxu1  ;;  %1877 = vmatmul.mubr.msk.f32.vlgmr.msra.gmra.mxu0 %vm980_vm9, %v897_v26  ;;  %v981_v28 = vsel %vm980_vm9, %v897_v26, 0.0 }
 0x303   : > { %1880 = vmatpush3.msra.mxu0 %v786_v51  ;;  %982 = vadd.xlane.f32.xlu1 %v981_v28  ;;  %v1272_v51 = vld [vmem:[%s2676_s10 + $0x10] sm:$0xff]  ;;  %v1383_v27 = vld [vmem:[%s2677_s11 + $0x18] sm:$0xff]  ;;  %v1381_v28 = vld [vmem:[%s2677_s11 + $0x8] sm:$0xff] }
 0x304   : > { %1893 = vmatprep.subr.mxu0 %v2147_v10  ;;  %1881 = vmatprep.mubr.msk.f32.mxu0 %vm980_vm9, %v1097_v38 }
 0x305   : > { %1913 = vmatpush3.msra.mxu1 %v1383_v27 }
 0x306   : > { %1882 = vmatmul.mubr.msk.f32.vlgmr.msra.gmra.mxu0 %vm980_vm9, %v1098_v40  ;;  %1914 = vmatprep.subr.mxu1 %v2147_v10 }
 0x307   : > { %993 = vadd.xlane.f32.xlu1 %v992_v29  ;;  %1894 = vmatpush3.msra.mxu0 %v1277_v39  ;;  %v1380_v29 = vld [vmem:[%s2677_s11] sm:$0xff] }
 0x308   : > { %1895 = vmatprep.subr.mxu0 %v2147_v10  ;;  %1884 = vmatprep.mubr.msk.f32.mxu0 %vm980_vm9, %v1099_v43 }
 0x309   : > { %1896 = vmatpush3.msra.mxu0 %v1276_v41 }
 0x30a   : > { %1897 = vmatprep.subr.mxu0 %v2147_v10  ;;  %1885 = vmatmul.mubr.msk.f32.gmra.mxu0 %vm980_vm9, %v1100_v46 }
 0x30b   : > { %1898 = vmatpush3.msra.mxu0 %v1275_v42  ;;  %1887 = vmatprep.mubr.msk.f32.mxu0 %vm980_vm9, %v1101_v47  ;;  %v1737_v42 = vld [vmem:[%s2669_s3] ss:$0 sm:$0xff]  ;;  %v1505_v47 = vld [vmem:[%s2679_s13 + $0x78] sm:$0xff] }
 0x30c   : > { %1899 = vmatprep.subr.mxu0 %v2147_v10 }
 0x30d   : > { %1900 = vmatpush3.msra.mxu0 %v1274_v44  ;;  %v1738_v44 = vld [vmem:[%s2670_s4] ss:$0 sm:$0xff] }
 0x30e   : > { %1901 = vmatprep.subr.mxu0 %v2147_v10  ;;  %1888 = vmatmul.mubr.msk.f32.gmra.mxu0 %vm980_vm9, %v1102_v48  ;;  %v1504_v48 = vld [vmem:[%s2679_s13 + $0x70] sm:$0xff] }
 0x30f   : > { %1902 = vmatpush3.msra.mxu0 %v1273_v45  ;;  %1890 = vmatprep.mubr.msk.f32.mxu0 %vm980_vm9, %v1103_v49  ;;  %v1503_v49 = vld [vmem:[%s2679_s13 + $0x68] sm:$0xff] }
 0x310   : > { %1903 = vmatprep.subr.mxu0 %v2147_v10 }
 0x311   : > { %1904 = vmatpush3.msra.mxu0 %v1272_v51  ;;  %v1501_v51 = vld [vmem:[%s2679_s13 + $0x58] sm:$0xff] }
 0x312   : > { %1891 = vmatmul.mubr.msk.f32.gmra.mxu0 %vm980_vm9, %v1104_v50  ;;  %1905 = vmatprep.subr.mxu0 %v2147_v10  ;;  %v1502_v50 = vld [vmem:[%s2679_s13 + $0x60] sm:$0xff] }
 0x313   : > { %1909 = vmatprep.mubr.msk.f32.mxu0 %vm2148_vm3, %v2147_v10  ;;  %1906 = vmatpush3.msra.mxu0 %v1271_v52  ;;  %v1500_v52 = vld [vmem:[%s2679_s13 + $0x50] sm:$0xff] }
 0x314   : > { %1907 = vmatprep.subr.mxu0 %v2147_v10 }
 0x315   : > { %1908 = vmatpush3.msra.mxu0 %v1270_v53  ;;  %v1499_v53 = vld [vmem:[%s2679_s13 + $0x48] sm:$0xff] }
 0x38c   : > { %v983_v54 = vpop.xlane.xlu1 %982 }
 0x390   : > { %v994_v55 = vpop.xlane.xlu1 %993 }
 0x391   : > { %v1068_v56 = vadd.f32 %v994_v55, %v983_v54  ;;  %v1498_v54 = vld [vmem:[%s2679_s13 + $0x40] sm:$0xff]  ;;  %v1497_v55 = vld [vmem:[%s2679_s13 + $0x38] sm:$0xff] }
 0x393   : > { %v1069_v57 = vadd.f32 1e-08, %v1068_v56  ;;  %v1496_v56 = vld [vmem:[%s2679_s13 + $0x30] sm:$0xff] }
 0x395   : > { %2042 = vrcp.f32 %v1069_v57  ;;  %v1495_v57 = vld [vmem:[%s2679_s13 + $0x28] sm:$0xff] }
 0x3a2   : > { %v2043_v60 = vpop.eup %2042 }
 0x3c2   : > { %v1064_v58 = vpop.f32.mrf.mxu0 }
 0x3c3   : > { %v1065_v59 = vadd.f32 %v1064_v58, %v976_v22  ;;  %v1494_v58 = vld [vmem:[%s2679_s13 + $0x20] sm:$0xff] }
 0x3c4   : > { %v1878_v61 = vpop.f32.mrf.mxu0 }
 0x3c5   : > { %v1071_v62 = vmul.f32 %v2043_v60, %v1065_v59  ;;  %v1493_v59 = vld [vmem:[%s2679_s13 + $0x18] sm:$0xff]  ;;  %v1492_v60 = vld [vmem:[%s2679_s13 + $0x10] sm:$0xff]  ;;  %v1491_v61 = vld [vmem:[%s2679_s13 + $0x8] sm:$0xff] }
 0x3c6   : > { %v1883_v2 = vpop.f32.mrf.mxu0 }
 0x3c7   : > { %1910 = vmatmul.mubr.msk.f32.vlgmr.msra.gmra.mxu0 %vm817_vm6, %v1071_v62  ;;  %v1243_v3 = vadd.f32 %v1883_v2, %v1074_v63  ;;  %v1490_v62 = vld [vmem:[%s2679_s13] sm:$0xff] }
 0x3c8   : > { %v1203_v4 = vpop.f32.mrf.mxu0  ;;  %v1739_v63 = vld [vmem:[%s2678_s12] ss:$0 sm:$0xff] }
 0x3c9   : > { %1251 = vst.msk [vmem:[#allocation2 + $0x8] sm:$0xff] %vm817_vm6, %v1243_v3  ;;  %v1242_v5 = vadd.f32 %v1203_v4, %v1073_v0 }
 0x3ca   : > { %v1886_v8 = vpop.f32.mrf.mxu0 }
 0x3cb   : > { %1250 = vst.msk [vmem:[#allocation2] sm:$0xff] %vm817_vm6, %v1242_v5  ;;  %v1245_v9 = vadd.f32 %v1886_v8, %v1076_v6 }
 0x3cc   : > { %v1213_v11 = vpop.f32.mrf.mxu0 }
 0x3cd   : > { %1253 = vst.msk [vmem:[#allocation2 + $0x18] sm:$0xff] %vm817_vm6, %v1245_v9  ;;  %v1244_v36 = vadd.f32 %v1213_v11, %v1075_v7 }
 0x3ce   : > { %v1889_v13 = vpop.f32.mrf.mxu0 }
 0x3cf   : > { %1252 = vst.msk [vmem:[#allocation2 + $0x10] sm:$0xff] %vm817_vm6, %v1244_v36  ;;  %v1247_v14 = vadd.f32 %v1889_v13, %v1078_v37 }
 0x3d0   : > { %v1223_v15 = vpop.f32.mrf.mxu0 }
 0x3d1   : > { %1255 = vst.msk [vmem:[#allocation2 + $0x28] sm:$0xff] %vm817_vm6, %v1247_v14  ;;  %v1246_v34 = vadd.f32 %v1223_v15, %v1077_v12 }
 0x3d2   : > { %v1892_v17 = vpop.f32.mrf.mxu0 }
 0x3d3   : > { %1254 = vst.msk [vmem:[#allocation2 + $0x20] sm:$0xff] %vm817_vm6, %v1246_v34  ;;  %v1249_v18 = vadd.f32 %v1892_v17, %v1080_v35 }
 0x3d4   : > { %v1233_v19 = vpop.f32.mrf.mxu0 }
 0x3d5   : > { %1257 = vst.msk [vmem:[#allocation2 + $0x38] sm:$0xff] %vm817_vm6, %v1249_v18  ;;  %v1248_v32 = vadd.f32 %v1233_v19, %v1079_v16 }
 0x3d7   : > { %1256 = vst.msk [vmem:[#allocation2 + $0x30] sm:$0xff] %vm817_vm6, %v1248_v32 }
 0x487   : > { %v1347_v33 = vpop.f32.mrf.mxu0 }
 0x488   : > { %v1348_v20 = vadd.f32 %v1347_v33, %v2365_v25  ;;  %v1382_v25 = vld [vmem:[%s2677_s11 + $0x10] sm:$0xff] }
 0x489   : > { %v1911_v21 = vpop.f32.mrf.mxu0  ;;  %1915 = vmatpush3.msra.mxu1 %v1382_v25 }
 0x48a   : > { %v1353_v22 = vsel %vm536_vm2, %v1348_v20, 0.0  ;;  %1916 = vmatprep.subr.mxu1 %v2147_v10 }
 0x48b   : > { %1354 = vadd.xlane.f32.xlu1 %v1353_v22  ;;  %1917 = vmatpush3.msra.mxu1 %v1381_v28 }
 0x48c   : > { %1918 = vmatprep.subr.mxu1 %v2147_v10 }
 0x48d   : > { %1919 = vmatpush3.msra.mxu1 %v1380_v29 }
 0x48e   : > { %1923 = vmatprep.subr.mxu1 %v2147_v10 }
 0x514   : > { %v1355_v23 = vpop.xlane.xlu1 %1354 }
 0x515   : > { %v1356_v24 = vmul.f32 0.03125, %v1355_v23  ;;  %v1741_v23 = vld [vmem:[%s2680_s14] ss:$0 sm:$0xff] }
 0x517   : > { %v1357_v30 = vsub.f32 %v1348_v20, %v1356_v24 }
 0x519   : > { %v1358_v26 = vmul.f32 %v1357_v30, %v1357_v30 }
 0x51b   : > { %v1359_v31 = vsel %vm536_vm2, %v1358_v26, 0.0 }
 0x51c   : > { %1360 = vadd.xlane.f32.xlu1 %v1359_v31 }
 0x5a5   : > { %v1361_v38 = vpop.xlane.xlu1 %1360 }
 0x5a6   : > { %v1362_v39 = vmul.f32 0.03125, %v1361_v38 }
 0x5a8   : > { %v1363_v40 = vadd.f32 1e-05, %v1362_v39 }
 0x5aa   : > { %2044 = vrsqrt.f32 %v1363_v40 }
 0x5b7   : > { %v2045_v41 = vpop.eup %2044 }
 0x5b8   : > { %v1365_v43 = vmul.f32 %v2045_v41, %v1357_v30 }
 0x5ba   : > { %v1372_v45 = vmul.f32 %v1737_v42, %v1365_v43 }
 0x5bc   : > { %v2529_v46 = vadd.f32 %v1738_v44, %v1372_v45  ;;  %v1742_v44 = vld [vmem:[%s2671_s5] ss:$0 sm:$0xff] }
 0x5be   : > { %1921 = vmatmul.mubr.msk.f32.vlgmr.msra.gmra.mxu1 %vm536_vm2, %v2529_v46 }
 0x5bf   : > { %1955 = vmatprep.mubr.msk.f32.mxu1 %vm2148_vm3, %v2147_v10  ;;  %1924 = vmatpush3.msra.mxu1 %v1505_v47 }
 0x5c0   : > { %1925 = vmatprep.subr.mxu1 %v2147_v10 }
 0x5c1   : > { %1926 = vmatpush3.msra.mxu1 %v1504_v48 }
 0x5c2   : > { %1927 = vmatprep.subr.mxu1 %v2147_v10 }
 0x5c3   : > { %1928 = vmatpush3.msra.mxu1 %v1503_v49 }
 0x5c4   : > { %1929 = vmatprep.subr.mxu1 %v2147_v10 }
 0x5c5   : > { %1930 = vmatpush3.msra.mxu1 %v1502_v50 }
 0x5c6   : > { %1931 = vmatprep.subr.mxu1 %v2147_v10 }
 0x5c7   : > { %1932 = vmatpush3.msra.mxu1 %v1501_v51 }
 0x5c8   : > { %1933 = vmatprep.subr.mxu1 %v2147_v10 }
 0x5c9   : > { %1934 = vmatpush3.msra.mxu1 %v1500_v52 }
 0x5ca   : > { %1935 = vmatprep.subr.mxu1 %v2147_v10 }
 0x5cb   : > { %1936 = vmatpush3.msra.mxu1 %v1499_v53 }
 0x5cc   : > { %1937 = vmatprep.subr.mxu1 %v2147_v10 }
 0x5cd   : > { %1938 = vmatpush3.msra.mxu1 %v1498_v54 }
 0x5ce   : > { %1939 = vmatprep.subr.mxu1 %v2147_v10 }
 0x5cf   : > { %1940 = vmatpush3.msra.mxu1 %v1497_v55 }
 0x5d0   : > { %1941 = vmatprep.subr.mxu1 %v2147_v10 }
 0x5d1   : > { %1942 = vmatpush3.msra.mxu1 %v1496_v56 }
 0x5d2   : > { %1943 = vmatprep.subr.mxu1 %v2147_v10 }
 0x5d3   : > { %1944 = vmatpush3.msra.mxu1 %v1495_v57 }
 0x5d4   : > { %1945 = vmatprep.subr.mxu1 %v2147_v10 }
 0x5d5   : > { %1946 = vmatpush3.msra.mxu1 %v1494_v58 }
 0x5d6   : > { %1947 = vmatprep.subr.mxu1 %v2147_v10 }
 0x5d7   : > { %1948 = vmatpush3.msra.mxu1 %v1493_v59 }
 0x5d8   : > { %1949 = vmatprep.subr.mxu1 %v2147_v10 }
 0x5d9   : > { %1950 = vmatpush3.msra.mxu1 %v1492_v60 }
 0x5da   : > { %1951 = vmatprep.subr.mxu1 %v2147_v10 }
 0x5db   : > { %1952 = vmatpush3.msra.mxu1 %v1491_v61 }
 0x5dc   : > { %1953 = vmatprep.subr.mxu1 %v2147_v10 }
 0x5dd   : > { %1954 = vmatpush3.msra.mxu1 %v1490_v62 }
 0x67e   : > { %v1460_v0 = vpop.f32.mrf.mxu1 }
 0x67f   : > { %v1461_v2 = vadd.f32 %v1739_v63, %v1460_v0 }
 0x680   : > { %v1922_v3 = vpop.f32.mrf.mxu1 }
 0x681   : > { %v1465_v4 = vmul.f32 0.70710677, %v1461_v2  ;;  %v1464_v20 = vmul.f32 0.5, %v1461_v2 }
 0x683   : > { %v1466_v5 = vand.u32 2147483647, %v1465_v4  ;;  %vm1485_vm10 = vcmp.ge.f32.partialorder %v1465_v4, 0.0 }
 0x685   : > { %v1467_v6 = vmul.f32 0.3275911, %v1466_v5  ;;  %v1479_v8 = vsub.f32 0.0, %v1466_v5 }
 0x687   : > { %v1468_v7 = vadd.f32 1.0, %v1467_v6  ;;  %v1480_v9 = vmul.f32 %v1479_v8, %v1466_v5 }
 0x689   : > { %2046 = vrcp.f32 %v1468_v7  ;;  %v1481_v37 = vmul.f32 1.442695, %v1480_v9 }
 0x68b   : > { %2048 = vpow2.f32 %v1481_v37 }
 0x696   : > { %v2047_v11 = vpop.eup %2046 }
 0x697   : > { %v1470_v36 = vmul.f32 1.0614054, %v2047_v11 }
 0x698   : > { %v2049_v17 = vpop.eup %2048 }
 0x699   : > { %v1471_v12 = vadd.f32 -1.4531521, %v1470_v36 }
 0x69b   : > { %v1472_v10 = vmul.f32 %v2047_v11, %v1471_v12 }
 0x69d   : > { %v1473_v13 = vadd.f32 1.4214138, %v1472_v10 }
 0x69f   : > { %v1474_v14 = vmul.f32 %v2047_v11, %v1473_v13 }
 0x6a1   : > { %v1475_v15 = vadd.f32 -0.28449672, %v1474_v14 }
 0x6a3   : > { %v1476_v34 = vmul.f32 %v2047_v11, %v1475_v15 }
 0x6a5   : > { %v1477_v35 = vadd.f32 0.2548296, %v1476_v34 }
 0x6a7   : > { %v1478_v16 = vmul.f32 %v2047_v11, %v1477_v35 }
 0x6a9   : > { %v1483_v18 = vmul.f32 %v2049_v17, %v1478_v16 }
 0x6ab   : > { %v1484_v19 = vsub.f32 1.0, %v1483_v18 }
 0x6ad   : > { %v1486_v32 = vsub.f32 0.0, %v1484_v19 }
 0x6af   : > { %v1487_v33 = vsel %vm1485_vm10, %v1484_v19, %v1486_v32 }
 0x6b0   : > { %v1488_v21 = vadd.f32 1.0, %v1487_v33 }
 0x6b2   : > { %v1489_v22 = vmul.f32 %v1488_v21, %v1464_v20 }
 0x6b4   : > { %1956 = vmatmul.mubr.f32.vlgmr.msra.gmra.mxu1 %v1489_v22 }
 0x774   : > { %v1579_v24 = vpop.f32.mrf.mxu1 }
 0x775   : > { %v1580_v30 = vadd.f32 %v1741_v23, %v1579_v24 }
 0x776   : > { %v1957_v26 = vpop.f32.mrf.mxu1 }
 0x777   : > { %v1583_v31 = vadd.f32 %v1580_v30, %v2529_v46  ;;  %v1743_v46 = vld [vmem:[%s2707_s29] ss:$0 sm:$0xff] }
 0x779   : > { %v1586_v27 = vsel %vm536_vm2, %v1583_v31, 0.0 }
 0x77a   : > { %1587 = vadd.xlane.f32.xlu1 %v1586_v27 }
 0x803   : > { %v1588_v25 = vpop.xlane.xlu1 %1587 }
 0x804   : > { %v1589_v28 = vmul.f32 0.03125, %v1588_v25 }
 0x806   : > { %v1590_v29 = vsub.f32 %v1583_v31, %v1589_v28 }
 0x808   : > { %v1591_v38 = vmul.f32 %v1590_v29, %v1590_v29 }
 0x80a   : > { %v1592_v39 = vsel %vm536_vm2, %v1591_v38, 0.0 }
 0x80b   : > { %1593 = vadd.xlane.f32.xlu1 %v1592_v39 }
 0x894   : > { %v1594_v40 = vpop.xlane.xlu1 %1593 }
 0x895   : > { %v1595_v41 = vmul.f32 0.03125, %v1594_v40 }
 0x897   : > { %v1596_v42 = vadd.f32 1e-05, %v1595_v41 }
 0x899   : > { %2050 = vrsqrt.f32 %v1596_v42 }
 0x8a6   : > { %v2051_v43 = vpop.eup %2050 }
 0x8a7   : > { %v1598_v45 = vmul.f32 %v2051_v43, %v1590_v29 }
 0x8a9   : > { %v1605_v47 = vmul.f32 %v1742_v44, %v1598_v45 }
 0x8ab   : > { %v1612_v48 = vadd.f32 %v1743_v46, %v1605_v47 }
 0x8ad   : > { %v1613_v49 = vadd.f32 %v1612_v48, %v2315_v1 }
 0x8af   : > { %1614 = vst.msk [vmem:[%s509_s17] sm:$0xff] %vm536_vm2, %v1613_v49 }
 0x8b0   : > { %2065 = shalt.err (!%p2062_p9)
}
 0x8b1   : > { %s2066_s0 = scalar_lea.hbm %s1629_s2, 128  ;;  %s2070_s28 = scalar_lea.hbm %s2708_s1, 512 }
 0x8b2   : > { %p2067_p10 = scmp.ne.s32.totalorder %s1629_s2, %s2066_s0  ;;  %p2071_p13 = scmp.lt.s32.totalorder %s1629_s2, %s2708_s1 }
 0x8b3   : > { %p2072_p0 = scmp.lt.s32.totalorder %s2070_s28, %s2066_s0 }
 0x8b4   : > { %p2068_p11 = pnand %p2067_p10, %p2281_p3 }
 0x8b5   : > { %p2073_p1 = por %p2072_p0, %p2071_p13 }
 0x8b6   : > { %p2069_p12 = pneg %p2068_p11 }
 0x8b8   : > { %p2074_p2 = pnand %p2073_p1, %p2069_p12 }
 0x8ba   : > { %2077 = shalt.err (!%p2074_p2)
}
 0x8bb   : > { %1958 = dma.vmem_to_hbm [thread:$0]  (%p2281_p3), %s1632_s27, 128, %s1629_s2, %s1616_s30  }
 0x8bc PF: > { %p1964_p4 = scmp.ge.s32.totalorder %s2144_s25, 2  ;;  %s1643_s21 = sand.u32 1, %s2116_s18  }
 0x8bd   : > { %s1644_s26 = scalar_lea.sflag [#allocation5], %s1643_s21 }
 0x8be   : > { %p1961_p5 = pnand %p1964_p4, %p2290_p8 }
 0x8c0   : > { %p1962_p6 = pneg %p1961_p5 }
 0x8c2   : > { %2111 = dma.done.wait (%p1962_p6), %s1644_s26, 128  }
 0x8c3   : > { %2113 = vsyncadd (%p1962_p6), %s1644_s26, 4294967168  ;;  %s28_s25 = sadd.s32 1, %s2144_s25   ;;  %s2711_s6 = sld [smem:[#allocation7_spill]] }
 0x8c4   : > { %p25_p7 = scmp.ge.s32.totalorder %s28_s25, 6   ;;  %s2712_s20 = sld [smem:[#allocation13_spill]] }
 0x8c5   : > { %s2713_s21 = sld [smem:[#allocation8_spill]]  ;;  %s2717_s18 = smov %s2120_s19 }
 0x8c6   : > { %s2714_s22 = sld [smem:[#allocation9_spill]]  ;;  %27 = sbr.rel (!%p25_p7) target bundleno = 11 (0xb), region = 119 }
 0x8c7   : > { %s2715_s23 = sld [smem:[#allocation10_spill]] }
 0x8c8   : > { %s2716_s24 = sld [smem:[#allocation11_spill]] }
 0x8c9   : > { %s2718_s19 = smov %s2711_s6 }
 0x8cb   :  { %1649 = vsyncpa [#allocation5], 1 }
 0x8cc   :  { %1651 = vsyncpa [#allocation5 + $0x1], 1 }

</bundles_post_ra>
